<compile_context>
chip_gen: v6e
topology: v6e:2x2x1
jax: 0.10.0
libtpu: 0.0.40
codegen_flags: <defaults>
</compile_context>

<pallas_src>
import jax
import jax.numpy as jnp
from jax.experimental import pallas as pl
from jax.experimental.pallas import tpu as pltpu

# ----------------------------- configuration --------------------------------
B, T, C_IN = 2, 16, 4        # batch, seq len, input feature dims
HIDDEN = 32                  # TSEncoder hidden_dims
OUT = 32                     # TSEncoder output_dims (== HIDDEN so all conv
                             # weight taps share one (H, H) shape)
DEPTH = 2                    # channels = [HIDDEN]*DEPTH + [OUT]
N_BLOCKS = DEPTH + 1
KS = 3                       # conv kernel size
BT = B * T                   # batch folded onto the sublane (time) axis


def _gelu(x):
    # TODO(synk): PyTorch F.gelu default is the exact erf-based GELU; the tanh
    # approximation is used here (max abs diff ~1e-3) since erf lowering inside
    # Mosaic is not guaranteed.
    return jax.nn.gelu(x, approximate=True)


def ts2vec_encoder_kernel(x_ref, win_ref, bin_ref, convw_ref, convb_ref,
                          projw_ref, projb_ref, mprev_ref, mnext_ref, out_ref):
    x = x_ref[...]                           # (B*T, C_IN)
    bt = x.shape[0]

    # input_fc + NaN masking.  Any NaN in a row of x makes the whole output row
    # of the matmul NaN (rows are independent, NaN*0 = NaN), so an element-wise
    # select on the result reproduces the reference "zero NaN timesteps" without
    # the cross-lane isnan(x).any(-1) reduction.
    # NOTE: differs from isnan(x)-based masking only if x contains +/-inf.
    h_raw = (jnp.dot(x, win_ref[...], preferred_element_type=jnp.float32)
             + bin_ref[...])
    h = jnp.where(jnp.isnan(h_raw), 0.0, h_raw)

    convb = convb_ref[...]                   # (N_BLOCKS*2, HIDDEN), loaded once

    # DilatedConvEncoder
    for blk in range(N_BLOCKS):
        d = 2 ** blk
        # precomputed boundary masks, pre-broadcast to (BT, HIDDEN) in the
        # wrapper, loaded once per block and shared by both convs.  They also
        # zero rows where the roll wrapped across a sequence boundary.
        keep_prev = mprev_ref[blk]           # rows with a valid z[t-d]
        keep_next = mnext_ref[blk]           # rows with a valid z[t+d]

        final = blk == N_BLOCKS - 1
        if final:
            # final ConvBlock has a 1x1 projector on the residual path
            residual = (jnp.dot(h, projw_ref[...],
                                preferred_element_type=jnp.float32)
                        + projb_ref[...])
        else:
            residual = h

        z = _gelu(h)
        for ci in range(2):
            j = blk * 2 + ci
            base = j * KS
            # dilated taps via XLU rolls (static nonnegative shifts) + one
            # hoisted-mask multiply each, then three accumulated MXU matmuls
            # (no lane-axis concatenate).
            x_prev = keep_prev * pltpu.roll(z, d, axis=0)
            x_next = keep_next * pltpu.roll(z, bt - d, axis=0)
            y = (jnp.dot(x_prev, convw_ref[base + 0],
                         preferred_element_type=jnp.float32)
                 + jnp.dot(z, convw_ref[base + 1],
                           preferred_element_type=jnp.float32)
                 + jnp.dot(x_next, convw_ref[base + 2],
                           preferred_element_type=jnp.float32)
                 + convb[j:j + 1, :])
            z = _gelu(y) if ci == 0 else y
        h = z + residual

    # repr_dropout: identity in eval mode
    out_ref[...] = h.astype(out_ref.dtype)


def ts2vec_encoder(x, params, mask="all_true"):
    win, bin_, convw, convb, projw, projb = params

    # the roll + boundary-mask scheme assumes equal-length sequences and the
    # TS2Vec 'all_true' eval mask; assert those assumptions explicitly.
    assert mask == "all_true", "kernel assumes mask='all_true'"
    assert x.shape == (B, T, C_IN), x.shape

    # fold batch onto the sublane axis: (B, T, C) -> (B*T, C)
    x_flat = x.reshape(BT, C_IN)

    # per-block dilation boundary masks, precomputed & pre-broadcast so the
    # kernel does one multiply per tap and no in-kernel broadcasts.
    t_idx = jnp.tile(jnp.arange(T), B)                       # (BT,)
    dils = jnp.array([2 ** b for b in range(N_BLOCKS)])      # (N_BLOCKS,)
    keep_prev = (t_idx[None, :] >= dils[:, None]).astype(jnp.float32)
    keep_next = (t_idx[None, :] < (T - dils)[:, None]).astype(jnp.float32)
    mprev = jnp.broadcast_to(keep_prev[:, :, None], (N_BLOCKS, BT, HIDDEN))
    mnext = jnp.broadcast_to(keep_next[:, :, None], (N_BLOCKS, BT, HIDDEN))

    vmem = pl.BlockSpec(memory_space=pltpu.MemorySpace.VMEM)
    out = pl.pallas_call(
        ts2vec_encoder_kernel,
        out_shape=jax.ShapeDtypeStruct((BT, OUT), jnp.float32),
        in_specs=[vmem] * 9,
        out_specs=vmem,
    )(x_flat, win, bin_, convw, convb, projw, projb, mprev, mnext)
    return out.reshape(B, T, OUT)


# ---------------------------- pure-JAX reference -----------------------------
def reference(x, params):
    win, bin_, convw, convb, projw, projb = params
    outs = []
    for b in range(B):
        xb = x[b]
        nan_any = jnp.any(jnp.isnan(xb), axis=-1, keepdims=True)
        xb = jnp.where(nan_any, 0.0, xb)
        h = xb @ win + bin_
        h = jnp.where(nan_any, 0.0, h)
        for blk in range(N_BLOCKS):
            d = 2 ** blk
            final = blk == N_BLOCKS - 1
            residual = (h @ projw + projb) if final else h
            z = _gelu(h)
            for ci in range(2):
                base = (blk * 2 + ci) * KS
                zp = jnp.pad(z, ((d, d), (0, 0)))
                y = (zp[:T] @ convw[base + 0]
                     + zp[d:d + T] @ convw[base + 1]
                     + zp[2 * d:2 * d + T] @ convw[base + 2]
                     + convb[blk * 2 + ci])
                z = _gelu(y) if ci == 0 else y
            h = z + residual
        outs.append(h)
    return jnp.stack(outs, axis=0)


# --------------------------------- main --------------------------------------
if __name__ == "__main__":
    key = jax.random.PRNGKey(0)
    ks = jax.random.split(key, 8)

    # deterministic synthetic parameters (shapes implied by TSEncoder __init__)
    win = 0.1 * jax.random.normal(ks[0], (C_IN, HIDDEN), jnp.float32)
    bin_ = 0.05 * jax.random.normal(ks[1], (1, HIDDEN), jnp.float32)
    # conv weights: N_BLOCKS blocks x 2 convs x KS taps, each (Cin, Cout)
    convw = 0.1 * jax.random.normal(
        ks[2], (N_BLOCKS * 2 * KS, HIDDEN, HIDDEN), jnp.float32)
    convb = 0.05 * jax.random.normal(ks[3], (N_BLOCKS * 2, HIDDEN), jnp.float32)
    projw = 0.1 * jax.random.normal(ks[4], (HIDDEN, OUT), jnp.float32)
    projb = 0.05 * jax.random.normal(ks[5], (1, OUT), jnp.float32)
    params = (win, bin_, convw, convb, projw, projb)

    x = jax.random.normal(ks[6], (B, T, C_IN), jnp.float32)
    # exercise the NaN-masking branch, including a sequence-boundary timestep
    x = x.at[0, 3, 1].set(jnp.nan)
    x = x.at[1, 0, 2].set(jnp.nan)

    out = jax.block_until_ready(ts2vec_encoder(x, params))
    ref = jax.block_until_ready(reference(x, params))

    assert out.shape == (B, T, OUT), out.shape
    assert jnp.all(jnp.isfinite(out)), "non-finite output"
    assert jnp.allclose(out, ref, atol=1e-4, rtol=1e-4), \
        float(jnp.max(jnp.abs(out - ref)))

    print("KERNEL_OK")
</pallas_src>

<mosaic_0001>
module attributes {stable_mosaic.version = 11 : i64} {
  func.func @ts2vec_encoder_kernel(%arg0: memref<32x4xf32, #tpu.memory_space<vmem>>, %arg1: memref<4x32xf32, #tpu.memory_space<vmem>>, %arg2: memref<1x32xf32, #tpu.memory_space<vmem>>, %arg3: memref<18x32x32xf32, #tpu.memory_space<vmem>>, %arg4: memref<6x32xf32, #tpu.memory_space<vmem>>, %arg5: memref<32x32xf32, #tpu.memory_space<vmem>>, %arg6: memref<1x32xf32, #tpu.memory_space<vmem>>, %arg7: memref<3x32x32xf32, #tpu.memory_space<vmem>>, %arg8: memref<3x32x32xf32, #tpu.memory_space<vmem>>, %arg9: memref<32x32xf32, #tpu.memory_space<vmem>>) attributes {dimension_semantics = [], scalar_prefetch = 0 : i64, scratch_operands = 0 : i64, tpu.core_type = #tpu.core_type<tc>} {
    %c0 = arith.constant 0 : index
    %c0_0 = arith.constant 0 : index
    %0 = vector.load %arg0[%c0, %c0_0] : memref<32x4xf32, #tpu.memory_space<vmem>>, vector<32x4xf32>
    %c0_1 = arith.constant 0 : index
    %c0_2 = arith.constant 0 : index
    %1 = vector.load %arg1[%c0_1, %c0_2] : memref<4x32xf32, #tpu.memory_space<vmem>>, vector<4x32xf32>
    %cst = arith.constant dense<0.000000e+00> : vector<32x32xf32>
    %2 = tpu.matmul %0, %1, %cst {dimension_numbers = #tpu.dot_dimension_numbers<[1], [0], [0], [1], [0, 0, 1, 1], [], []>} : vector<32x4xf32>, vector<4x32xf32>, vector<32x32xf32> -> vector<32x32xf32>
    %c0_3 = arith.constant 0 : index
    %c0_4 = arith.constant 0 : index
    %3 = vector.load %arg2[%c0_3, %c0_4] : memref<1x32xf32, #tpu.memory_space<vmem>>, vector<1x32xf32>
    %4 = vector.broadcast %3 : vector<1x32xf32> to vector<32x32xf32>
    %5 = arith.addf %2, %4 : vector<32x32xf32>
    %6 = arith.cmpf one, %5, %5 : vector<32x32xf32>
    %cst_5 = arith.constant 0.000000e+00 : f32
    %7 = vector.broadcast %cst_5 : f32 to vector<32x32xf32>
    %8 = arith.select %6, %7, %5 : vector<32x32xi1>, vector<32x32xf32>
    %c0_6 = arith.constant 0 : index
    %c0_7 = arith.constant 0 : index
    %9 = vector.load %arg4[%c0_6, %c0_7] : memref<6x32xf32, #tpu.memory_space<vmem>>, vector<6x32xf32>
    %c0_8 = arith.constant 0 : index
    %c0_9 = arith.constant 0 : index
    %c0_10 = arith.constant 0 : index
    %10 = vector.load %arg7[%c0_8, %c0_9, %c0_10] : memref<3x32x32xf32, #tpu.memory_space<vmem>>, vector<1x32x32xf32>
    %11 = vector.shape_cast %10 : vector<1x32x32xf32> to vector<32x32xf32>
    %c0_11 = arith.constant 0 : index
    %c0_12 = arith.constant 0 : index
    %c0_13 = arith.constant 0 : index
    %12 = vector.load %arg8[%c0_11, %c0_12, %c0_13] : memref<3x32x32xf32, #tpu.memory_space<vmem>>, vector<1x32x32xf32>
    %13 = vector.shape_cast %12 : vector<1x32x32xf32> to vector<32x32xf32>
    %14 = arith.mulf %8, %8 : vector<32x32xf32>
    %15 = arith.mulf %8, %14 : vector<32x32xf32>
    %cst_14 = arith.constant 4.471500e-02 : f32
    %16 = vector.broadcast %cst_14 : f32 to vector<32x32xf32>
    %17 = arith.mulf %16, %15 : vector<32x32xf32>
    %18 = arith.addf %8, %17 : vector<32x32xf32>
    %cst_15 = arith.constant 0.797884583 : f32
    %19 = vector.broadcast %cst_15 : f32 to vector<32x32xf32>
    %20 = arith.mulf %19, %18 : vector<32x32xf32>
    %21 = math.tanh %20 : vector<32x32xf32>
    %cst_16 = arith.constant 1.000000e+00 : f32
    %22 = vector.broadcast %cst_16 : f32 to vector<32x32xf32>
    %23 = arith.addf %22, %21 : vector<32x32xf32>
    %cst_17 = arith.constant 5.000000e-01 : f32
    %24 = vector.broadcast %cst_17 : f32 to vector<32x32xf32>
    %25 = arith.mulf %24, %23 : vector<32x32xf32>
    %26 = arith.mulf %8, %25 : vector<32x32xf32>
    %c1_i32 = arith.constant 1 : i32
    %27 = tpu.dynamic_rotate %26 by %c1_i32 dim 0 : vector<32x32xf32>, i32 -> vector<32x32xf32>
    %28 = arith.mulf %11, %27 : vector<32x32xf32>
    %c31_i32 = arith.constant 31 : i32
    %29 = tpu.dynamic_rotate %26 by %c31_i32 dim 0 : vector<32x32xf32>, i32 -> vector<32x32xf32>
    %30 = arith.mulf %13, %29 : vector<32x32xf32>
    %c0_18 = arith.constant 0 : index
    %c0_19 = arith.constant 0 : index
    %c0_20 = arith.constant 0 : index
    %31 = vector.load %arg3[%c0_18, %c0_19, %c0_20] : memref<18x32x32xf32, #tpu.memory_space<vmem>>, vector<1x32x32xf32>
    %32 = vector.shape_cast %31 : vector<1x32x32xf32> to vector<32x32xf32>
    %cst_21 = arith.constant dense<0.000000e+00> : vector<32x32xf32>
    %33 = tpu.matmul %28, %32, %cst_21 {dimension_numbers = #tpu.dot_dimension_numbers<[1], [0], [0], [1], [0, 0, 1, 1], [], []>} : vector<32x32xf32>, vector<32x32xf32>, vector<32x32xf32> -> vector<32x32xf32>
    %c1 = arith.constant 1 : index
    %c0_22 = arith.constant 0 : index
    %c0_23 = arith.constant 0 : index
    %34 = vector.load %arg3[%c1, %c0_22, %c0_23] : memref<18x32x32xf32, #tpu.memory_space<vmem>>, vector<1x32x32xf32>
    %35 = vector.shape_cast %34 : vector<1x32x32xf32> to vector<32x32xf32>
    %cst_24 = arith.constant dense<0.000000e+00> : vector<32x32xf32>
    %36 = tpu.matmul %26, %35, %cst_24 {dimension_numbers = #tpu.dot_dimension_numbers<[1], [0], [0], [1], [0, 0, 1, 1], [], []>} : vector<32x32xf32>, vector<32x32xf32>, vector<32x32xf32> -> vector<32x32xf32>
    %37 = arith.addf %33, %36 : vector<32x32xf32>
    %c2 = arith.constant 2 : index
    %c0_25 = arith.constant 0 : index
    %c0_26 = arith.constant 0 : index
    %38 = vector.load %arg3[%c2, %c0_25, %c0_26] : memref<18x32x32xf32, #tpu.memory_space<vmem>>, vector<1x32x32xf32>
    %39 = vector.shape_cast %38 : vector<1x32x32xf32> to vector<32x32xf32>
    %cst_27 = arith.constant dense<0.000000e+00> : vector<32x32xf32>
    %40 = tpu.matmul %30, %39, %cst_27 {dimension_numbers = #tpu.dot_dimension_numbers<[1], [0], [0], [1], [0, 0, 1, 1], [], []>} : vector<32x32xf32>, vector<32x32xf32>, vector<32x32xf32> -> vector<32x32xf32>
    %41 = arith.addf %37, %40 : vector<32x32xf32>
    %42 = vector.extract_strided_slice %9 {offsets = [0, 0], sizes = [1, 32], strides = [1, 1]} : vector<6x32xf32> to vector<1x32xf32>
    %43 = vector.broadcast %42 : vector<1x32xf32> to vector<32x32xf32>
    %44 = arith.addf %41, %43 : vector<32x32xf32>
    %45 = arith.mulf %44, %44 : vector<32x32xf32>
    %46 = arith.mulf %44, %45 : vector<32x32xf32>
    %cst_28 = arith.constant 4.471500e-02 : f32
    %47 = vector.broadcast %cst_28 : f32 to vector<32x32xf32>
    %48 = arith.mulf %47, %46 : vector<32x32xf32>
    %49 = arith.addf %44, %48 : vector<32x32xf32>
    %cst_29 = arith.constant 0.797884583 : f32
    %50 = vector.broadcast %cst_29 : f32 to vector<32x32xf32>
    %51 = arith.mulf %50, %49 : vector<32x32xf32>
    %52 = math.tanh %51 : vector<32x32xf32>
    %cst_30 = arith.constant 1.000000e+00 : f32
    %53 = vector.broadcast %cst_30 : f32 to vector<32x32xf32>
    %54 = arith.addf %53, %52 : vector<32x32xf32>
    %cst_31 = arith.constant 5.000000e-01 : f32
    %55 = vector.broadcast %cst_31 : f32 to vector<32x32xf32>
    %56 = arith.mulf %55, %54 : vector<32x32xf32>
    %57 = arith.mulf %44, %56 : vector<32x32xf32>
    %c1_i32_32 = arith.constant 1 : i32
    %58 = tpu.dynamic_rotate %57 by %c1_i32_32 dim 0 : vector<32x32xf32>, i32 -> vector<32x32xf32>
    %59 = arith.mulf %11, %58 : vector<32x32xf32>
    %c31_i32_33 = arith.constant 31 : i32
    %60 = tpu.dynamic_rotate %57 by %c31_i32_33 dim 0 : vector<32x32xf32>, i32 -> vector<32x32xf32>
    %61 = arith.mulf %13, %60 : vector<32x32xf32>
    %c3 = arith.constant 3 : index
    %c0_34 = arith.constant 0 : index
    %c0_35 = arith.constant 0 : index
    %62 = vector.load %arg3[%c3, %c0_34, %c0_35] : memref<18x32x32xf32, #tpu.memory_space<vmem>>, vector<1x32x32xf32>
    %63 = vector.shape_cast %62 : vector<1x32x32xf32> to vector<32x32xf32>
    %cst_36 = arith.constant dense<0.000000e+00> : vector<32x32xf32>
    %64 = tpu.matmul %59, %63, %cst_36 {dimension_numbers = #tpu.dot_dimension_numbers<[1], [0], [0], [1], [0, 0, 1, 1], [], []>} : vector<32x32xf32>, vector<32x32xf32>, vector<32x32xf32> -> vector<32x32xf32>
    %c4 = arith.constant 4 : index
    %c0_37 = arith.constant 0 : index
    %c0_38 = arith.constant 0 : index
    %65 = vector.load %arg3[%c4, %c0_37, %c0_38] : memref<18x32x32xf32, #tpu.memory_space<vmem>>, vector<1x32x32xf32>
    %66 = vector.shape_cast %65 : vector<1x32x32xf32> to vector<32x32xf32>
    %cst_39 = arith.constant dense<0.000000e+00> : vector<32x32xf32>
    %67 = tpu.matmul %57, %66, %cst_39 {dimension_numbers = #tpu.dot_dimension_numbers<[1], [0], [0], [1], [0, 0, 1, 1], [], []>} : vector<32x32xf32>, vector<32x32xf32>, vector<32x32xf32> -> vector<32x32xf32>
    %68 = arith.addf %64, %67 : vector<32x32xf32>
    %c5 = arith.constant 5 : index
    %c0_40 = arith.constant 0 : index
    %c0_41 = arith.constant 0 : index
    %69 = vector.load %arg3[%c5, %c0_40, %c0_41] : memref<18x32x32xf32, #tpu.memory_space<vmem>>, vector<1x32x32xf32>
    %70 = vector.shape_cast %69 : vector<1x32x32xf32> to vector<32x32xf32>
    %cst_42 = arith.constant dense<0.000000e+00> : vector<32x32xf32>
    %71 = tpu.matmul %61, %70, %cst_42 {dimension_numbers = #tpu.dot_dimension_numbers<[1], [0], [0], [1], [0, 0, 1, 1], [], []>} : vector<32x32xf32>, vector<32x32xf32>, vector<32x32xf32> -> vector<32x32xf32>
    %72 = arith.addf %68, %71 : vector<32x32xf32>
    %73 = vector.extract_strided_slice %9 {offsets = [1, 0], sizes = [1, 32], strides = [1, 1]} : vector<6x32xf32> to vector<1x32xf32>
    %74 = vector.broadcast %73 : vector<1x32xf32> to vector<32x32xf32>
    %75 = arith.addf %72, %74 : vector<32x32xf32>
    %76 = arith.addf %75, %8 : vector<32x32xf32>
    %c1_43 = arith.constant 1 : index
    %c0_44 = arith.constant 0 : index
    %c0_45 = arith.constant 0 : index
    %77 = vector.load %arg7[%c1_43, %c0_44, %c0_45] : memref<3x32x32xf32, #tpu.memory_space<vmem>>, vector<1x32x32xf32>
    %78 = vector.shape_cast %77 : vector<1x32x32xf32> to vector<32x32xf32>
    %c1_46 = arith.constant 1 : index
    %c0_47 = arith.constant 0 : index
    %c0_48 = arith.constant 0 : index
    %79 = vector.load %arg8[%c1_46, %c0_47, %c0_48] : memref<3x32x32xf32, #tpu.memory_space<vmem>>, vector<1x32x32xf32>
    %80 = vector.shape_cast %79 : vector<1x32x32xf32> to vector<32x32xf32>
    %81 = arith.mulf %76, %76 : vector<32x32xf32>
    %82 = arith.mulf %76, %81 : vector<32x32xf32>
    %cst_49 = arith.constant 4.471500e-02 : f32
    %83 = vector.broadcast %cst_49 : f32 to vector<32x32xf32>
    %84 = arith.mulf %83, %82 : vector<32x32xf32>
    %85 = arith.addf %76, %84 : vector<32x32xf32>
    %cst_50 = arith.constant 0.797884583 : f32
    %86 = vector.broadcast %cst_50 : f32 to vector<32x32xf32>
    %87 = arith.mulf %86, %85 : vector<32x32xf32>
    %88 = math.tanh %87 : vector<32x32xf32>
    %cst_51 = arith.constant 1.000000e+00 : f32
    %89 = vector.broadcast %cst_51 : f32 to vector<32x32xf32>
    %90 = arith.addf %89, %88 : vector<32x32xf32>
    %cst_52 = arith.constant 5.000000e-01 : f32
    %91 = vector.broadcast %cst_52 : f32 to vector<32x32xf32>
    %92 = arith.mulf %91, %90 : vector<32x32xf32>
    %93 = arith.mulf %76, %92 : vector<32x32xf32>
    %c2_i32 = arith.constant 2 : i32
    %94 = tpu.dynamic_rotate %93 by %c2_i32 dim 0 : vector<32x32xf32>, i32 -> vector<32x32xf32>
    %95 = arith.mulf %78, %94 : vector<32x32xf32>
    %c30_i32 = arith.constant 30 : i32
    %96 = tpu.dynamic_rotate %93 by %c30_i32 dim 0 : vector<32x32xf32>, i32 -> vector<32x32xf32>
    %97 = arith.mulf %80, %96 : vector<32x32xf32>
    %c6 = arith.constant 6 : index
    %c0_53 = arith.constant 0 : index
    %c0_54 = arith.constant 0 : index
    %98 = vector.load %arg3[%c6, %c0_53, %c0_54] : memref<18x32x32xf32, #tpu.memory_space<vmem>>, vector<1x32x32xf32>
    %99 = vector.shape_cast %98 : vector<1x32x32xf32> to vector<32x32xf32>
    %cst_55 = arith.constant dense<0.000000e+00> : vector<32x32xf32>
    %100 = tpu.matmul %95, %99, %cst_55 {dimension_numbers = #tpu.dot_dimension_numbers<[1], [0], [0], [1], [0, 0, 1, 1], [], []>} : vector<32x32xf32>, vector<32x32xf32>, vector<32x32xf32> -> vector<32x32xf32>
    %c7 = arith.constant 7 : index
    %c0_56 = arith.constant 0 : index
    %c0_57 = arith.constant 0 : index
    %101 = vector.load %arg3[%c7, %c0_56, %c0_57] : memref<18x32x32xf32, #tpu.memory_space<vmem>>, vector<1x32x32xf32>
    %102 = vector.shape_cast %101 : vector<1x32x32xf32> to vector<32x32xf32>
    %cst_58 = arith.constant dense<0.000000e+00> : vector<32x32xf32>
    %103 = tpu.matmul %93, %102, %cst_58 {dimension_numbers = #tpu.dot_dimension_numbers<[1], [0], [0], [1], [0, 0, 1, 1], [], []>} : vector<32x32xf32>, vector<32x32xf32>, vector<32x32xf32> -> vector<32x32xf32>
    %104 = arith.addf %100, %103 : vector<32x32xf32>
    %c8 = arith.constant 8 : index
    %c0_59 = arith.constant 0 : index
    %c0_60 = arith.constant 0 : index
    %105 = vector.load %arg3[%c8, %c0_59, %c0_60] : memref<18x32x32xf32, #tpu.memory_space<vmem>>, vector<1x32x32xf32>
    %106 = vector.shape_cast %105 : vector<1x32x32xf32> to vector<32x32xf32>
    %cst_61 = arith.constant dense<0.000000e+00> : vector<32x32xf32>
    %107 = tpu.matmul %97, %106, %cst_61 {dimension_numbers = #tpu.dot_dimension_numbers<[1], [0], [0], [1], [0, 0, 1, 1], [], []>} : vector<32x32xf32>, vector<32x32xf32>, vector<32x32xf32> -> vector<32x32xf32>
    %108 = arith.addf %104, %107 : vector<32x32xf32>
    %109 = vector.extract_strided_slice %9 {offsets = [2, 0], sizes = [1, 32], strides = [1, 1]} : vector<6x32xf32> to vector<1x32xf32>
    %110 = vector.broadcast %109 : vector<1x32xf32> to vector<32x32xf32>
    %111 = arith.addf %108, %110 : vector<32x32xf32>
    %112 = arith.mulf %111, %111 : vector<32x32xf32>
    %113 = arith.mulf %111, %112 : vector<32x32xf32>
    %cst_62 = arith.constant 4.471500e-02 : f32
    %114 = vector.broadcast %cst_62 : f32 to vector<32x32xf32>
    %115 = arith.mulf %114, %113 : vector<32x32xf32>
    %116 = arith.addf %111, %115 : vector<32x32xf32>
    %cst_63 = arith.constant 0.797884583 : f32
    %117 = vector.broadcast %cst_63 : f32 to vector<32x32xf32>
    %118 = arith.mulf %117, %116 : vector<32x32xf32>
    %119 = math.tanh %118 : vector<32x32xf32>
    %cst_64 = arith.constant 1.000000e+00 : f32
    %120 = vector.broadcast %cst_64 : f32 to vector<32x32xf32>
    %121 = arith.addf %120, %119 : vector<32x32xf32>
    %cst_65 = arith.constant 5.000000e-01 : f32
    %122 = vector.broadcast %cst_65 : f32 to vector<32x32xf32>
    %123 = arith.mulf %122, %121 : vector<32x32xf32>
    %124 = arith.mulf %111, %123 : vector<32x32xf32>
    %c2_i32_66 = arith.constant 2 : i32
    %125 = tpu.dynamic_rotate %124 by %c2_i32_66 dim 0 : vector<32x32xf32>, i32 -> vector<32x32xf32>
    %126 = arith.mulf %78, %125 : vector<32x32xf32>
    %c30_i32_67 = arith.constant 30 : i32
    %127 = tpu.dynamic_rotate %124 by %c30_i32_67 dim 0 : vector<32x32xf32>, i32 -> vector<32x32xf32>
    %128 = arith.mulf %80, %127 : vector<32x32xf32>
    %c9 = arith.constant 9 : index
    %c0_68 = arith.constant 0 : index
    %c0_69 = arith.constant 0 : index
    %129 = vector.load %arg3[%c9, %c0_68, %c0_69] : memref<18x32x32xf32, #tpu.memory_space<vmem>>, vector<1x32x32xf32>
    %130 = vector.shape_cast %129 : vector<1x32x32xf32> to vector<32x32xf32>
    %cst_70 = arith.constant dense<0.000000e+00> : vector<32x32xf32>
    %131 = tpu.matmul %126, %130, %cst_70 {dimension_numbers = #tpu.dot_dimension_numbers<[1], [0], [0], [1], [0, 0, 1, 1], [], []>} : vector<32x32xf32>, vector<32x32xf32>, vector<32x32xf32> -> vector<32x32xf32>
    %c10 = arith.constant 10 : index
    %c0_71 = arith.constant 0 : index
    %c0_72 = arith.constant 0 : index
    %132 = vector.load %arg3[%c10, %c0_71, %c0_72] : memref<18x32x32xf32, #tpu.memory_space<vmem>>, vector<1x32x32xf32>
    %133 = vector.shape_cast %132 : vector<1x32x32xf32> to vector<32x32xf32>
    %cst_73 = arith.constant dense<0.000000e+00> : vector<32x32xf32>
    %134 = tpu.matmul %124, %133, %cst_73 {dimension_numbers = #tpu.dot_dimension_numbers<[1], [0], [0], [1], [0, 0, 1, 1], [], []>} : vector<32x32xf32>, vector<32x32xf32>, vector<32x32xf32> -> vector<32x32xf32>
    %135 = arith.addf %131, %134 : vector<32x32xf32>
    %c11 = arith.constant 11 : index
    %c0_74 = arith.constant 0 : index
    %c0_75 = arith.constant 0 : index
    %136 = vector.load %arg3[%c11, %c0_74, %c0_75] : memref<18x32x32xf32, #tpu.memory_space<vmem>>, vector<1x32x32xf32>
    %137 = vector.shape_cast %136 : vector<1x32x32xf32> to vector<32x32xf32>
    %cst_76 = arith.constant dense<0.000000e+00> : vector<32x32xf32>
    %138 = tpu.matmul %128, %137, %cst_76 {dimension_numbers = #tpu.dot_dimension_numbers<[1], [0], [0], [1], [0, 0, 1, 1], [], []>} : vector<32x32xf32>, vector<32x32xf32>, vector<32x32xf32> -> vector<32x32xf32>
    %139 = arith.addf %135, %138 : vector<32x32xf32>
    %140 = vector.extract_strided_slice %9 {offsets = [3, 0], sizes = [1, 32], strides = [1, 1]} : vector<6x32xf32> to vector<1x32xf32>
    %141 = vector.broadcast %140 : vector<1x32xf32> to vector<32x32xf32>
    %142 = arith.addf %139, %141 : vector<32x32xf32>
    %143 = arith.addf %142, %76 : vector<32x32xf32>
    %c2_77 = arith.constant 2 : index
    %c0_78 = arith.constant 0 : index
    %c0_79 = arith.constant 0 : index
    %144 = vector.load %arg7[%c2_77, %c0_78, %c0_79] : memref<3x32x32xf32, #tpu.memory_space<vmem>>, vector<1x32x32xf32>
    %145 = vector.shape_cast %144 : vector<1x32x32xf32> to vector<32x32xf32>
    %c2_80 = arith.constant 2 : index
    %c0_81 = arith.constant 0 : index
    %c0_82 = arith.constant 0 : index
    %146 = vector.load %arg8[%c2_80, %c0_81, %c0_82] : memref<3x32x32xf32, #tpu.memory_space<vmem>>, vector<1x32x32xf32>
    %147 = vector.shape_cast %146 : vector<1x32x32xf32> to vector<32x32xf32>
    %c0_83 = arith.constant 0 : index
    %c0_84 = arith.constant 0 : index
    %148 = vector.load %arg5[%c0_83, %c0_84] : memref<32x32xf32, #tpu.memory_space<vmem>>, vector<32x32xf32>
    %cst_85 = arith.constant dense<0.000000e+00> : vector<32x32xf32>
    %149 = tpu.matmul %143, %148, %cst_85 {dimension_numbers = #tpu.dot_dimension_numbers<[1], [0], [0], [1], [0, 0, 1, 1], [], []>} : vector<32x32xf32>, vector<32x32xf32>, vector<32x32xf32> -> vector<32x32xf32>
    %c0_86 = arith.constant 0 : index
    %c0_87 = arith.constant 0 : index
    %150 = vector.load %arg6[%c0_86, %c0_87] : memref<1x32xf32, #tpu.memory_space<vmem>>, vector<1x32xf32>
    %151 = vector.broadcast %150 : vector<1x32xf32> to vector<32x32xf32>
    %152 = arith.addf %149, %151 : vector<32x32xf32>
    %153 = arith.mulf %143, %143 : vector<32x32xf32>
    %154 = arith.mulf %143, %153 : vector<32x32xf32>
    %cst_88 = arith.constant 4.471500e-02 : f32
    %155 = vector.broadcast %cst_88 : f32 to vector<32x32xf32>
    %156 = arith.mulf %155, %154 : vector<32x32xf32>
    %157 = arith.addf %143, %156 : vector<32x32xf32>
    %cst_89 = arith.constant 0.797884583 : f32
    %158 = vector.broadcast %cst_89 : f32 to vector<32x32xf32>
    %159 = arith.mulf %158, %157 : vector<32x32xf32>
    %160 = math.tanh %159 : vector<32x32xf32>
    %cst_90 = arith.constant 1.000000e+00 : f32
    %161 = vector.broadcast %cst_90 : f32 to vector<32x32xf32>
    %162 = arith.addf %161, %160 : vector<32x32xf32>
    %cst_91 = arith.constant 5.000000e-01 : f32
    %163 = vector.broadcast %cst_91 : f32 to vector<32x32xf32>
    %164 = arith.mulf %163, %162 : vector<32x32xf32>
    %165 = arith.mulf %143, %164 : vector<32x32xf32>
    %c4_i32 = arith.constant 4 : i32
    %166 = tpu.dynamic_rotate %165 by %c4_i32 dim 0 : vector<32x32xf32>, i32 -> vector<32x32xf32>
    %167 = arith.mulf %145, %166 : vector<32x32xf32>
    %c28_i32 = arith.constant 28 : i32
    %168 = tpu.dynamic_rotate %165 by %c28_i32 dim 0 : vector<32x32xf32>, i32 -> vector<32x32xf32>
    %169 = arith.mulf %147, %168 : vector<32x32xf32>
    %c12 = arith.constant 12 : index
    %c0_92 = arith.constant 0 : index
    %c0_93 = arith.constant 0 : index
    %170 = vector.load %arg3[%c12, %c0_92, %c0_93] : memref<18x32x32xf32, #tpu.memory_space<vmem>>, vector<1x32x32xf32>
    %171 = vector.shape_cast %170 : vector<1x32x32xf32> to vector<32x32xf32>
    %cst_94 = arith.constant dense<0.000000e+00> : vector<32x32xf32>
    %172 = tpu.matmul %167, %171, %cst_94 {dimension_numbers = #tpu.dot_dimension_numbers<[1], [0], [0], [1], [0, 0, 1, 1], [], []>} : vector<32x32xf32>, vector<32x32xf32>, vector<32x32xf32> -> vector<32x32xf32>
    %c13 = arith.constant 13 : index
    %c0_95 = arith.constant 0 : index
    %c0_96 = arith.constant 0 : index
    %173 = vector.load %arg3[%c13, %c0_95, %c0_96] : memref<18x32x32xf32, #tpu.memory_space<vmem>>, vector<1x32x32xf32>
    %174 = vector.shape_cast %173 : vector<1x32x32xf32> to vector<32x32xf32>
    %cst_97 = arith.constant dense<0.000000e+00> : vector<32x32xf32>
    %175 = tpu.matmul %165, %174, %cst_97 {dimension_numbers = #tpu.dot_dimension_numbers<[1], [0], [0], [1], [0, 0, 1, 1], [], []>} : vector<32x32xf32>, vector<32x32xf32>, vector<32x32xf32> -> vector<32x32xf32>
    %176 = arith.addf %172, %175 : vector<32x32xf32>
    %c14 = arith.constant 14 : index
    %c0_98 = arith.constant 0 : index
    %c0_99 = arith.constant 0 : index
    %177 = vector.load %arg3[%c14, %c0_98, %c0_99] : memref<18x32x32xf32, #tpu.memory_space<vmem>>, vector<1x32x32xf32>
    %178 = vector.shape_cast %177 : vector<1x32x32xf32> to vector<32x32xf32>
    %cst_100 = arith.constant dense<0.000000e+00> : vector<32x32xf32>
    %179 = tpu.matmul %169, %178, %cst_100 {dimension_numbers = #tpu.dot_dimension_numbers<[1], [0], [0], [1], [0, 0, 1, 1], [], []>} : vector<32x32xf32>, vector<32x32xf32>, vector<32x32xf32> -> vector<32x32xf32>
    %180 = arith.addf %176, %179 : vector<32x32xf32>
    %181 = vector.extract_strided_slice %9 {offsets = [4, 0], sizes = [1, 32], strides = [1, 1]} : vector<6x32xf32> to vector<1x32xf32>
    %182 = vector.broadcast %181 : vector<1x32xf32> to vector<32x32xf32>
    %183 = arith.addf %180, %182 : vector<32x32xf32>
    %184 = arith.mulf %183, %183 : vector<32x32xf32>
    %185 = arith.mulf %183, %184 : vector<32x32xf32>
    %cst_101 = arith.constant 4.471500e-02 : f32
    %186 = vector.broadcast %cst_101 : f32 to vector<32x32xf32>
    %187 = arith.mulf %186, %185 : vector<32x32xf32>
    %188 = arith.addf %183, %187 : vector<32x32xf32>
    %cst_102 = arith.constant 0.797884583 : f32
    %189 = vector.broadcast %cst_102 : f32 to vector<32x32xf32>
    %190 = arith.mulf %189, %188 : vector<32x32xf32>
    %191 = math.tanh %190 : vector<32x32xf32>
    %cst_103 = arith.constant 1.000000e+00 : f32
    %192 = vector.broadcast %cst_103 : f32 to vector<32x32xf32>
    %193 = arith.addf %192, %191 : vector<32x32xf32>
    %cst_104 = arith.constant 5.000000e-01 : f32
    %194 = vector.broadcast %cst_104 : f32 to vector<32x32xf32>
    %195 = arith.mulf %194, %193 : vector<32x32xf32>
    %196 = arith.mulf %183, %195 : vector<32x32xf32>
    %c4_i32_105 = arith.constant 4 : i32
    %197 = tpu.dynamic_rotate %196 by %c4_i32_105 dim 0 : vector<32x32xf32>, i32 -> vector<32x32xf32>
    %198 = arith.mulf %145, %197 : vector<32x32xf32>
    %c28_i32_106 = arith.constant 28 : i32
    %199 = tpu.dynamic_rotate %196 by %c28_i32_106 dim 0 : vector<32x32xf32>, i32 -> vector<32x32xf32>
    %200 = arith.mulf %147, %199 : vector<32x32xf32>
    %c15 = arith.constant 15 : index
    %c0_107 = arith.constant 0 : index
    %c0_108 = arith.constant 0 : index
    %201 = vector.load %arg3[%c15, %c0_107, %c0_108] : memref<18x32x32xf32, #tpu.memory_space<vmem>>, vector<1x32x32xf32>
    %202 = vector.shape_cast %201 : vector<1x32x32xf32> to vector<32x32xf32>
    %cst_109 = arith.constant dense<0.000000e+00> : vector<32x32xf32>
    %203 = tpu.matmul %198, %202, %cst_109 {dimension_numbers = #tpu.dot_dimension_numbers<[1], [0], [0], [1], [0, 0, 1, 1], [], []>} : vector<32x32xf32>, vector<32x32xf32>, vector<32x32xf32> -> vector<32x32xf32>
    %c16 = arith.constant 16 : index
    %c0_110 = arith.constant 0 : index
    %c0_111 = arith.constant 0 : index
    %204 = vector.load %arg3[%c16, %c0_110, %c0_111] : memref<18x32x32xf32, #tpu.memory_space<vmem>>, vector<1x32x32xf32>
    %205 = vector.shape_cast %204 : vector<1x32x32xf32> to vector<32x32xf32>
    %cst_112 = arith.constant dense<0.000000e+00> : vector<32x32xf32>
    %206 = tpu.matmul %196, %205, %cst_112 {dimension_numbers = #tpu.dot_dimension_numbers<[1], [0], [0], [1], [0, 0, 1, 1], [], []>} : vector<32x32xf32>, vector<32x32xf32>, vector<32x32xf32> -> vector<32x32xf32>
    %207 = arith.addf %203, %206 : vector<32x32xf32>
    %c17 = arith.constant 17 : index
    %c0_113 = arith.constant 0 : index
    %c0_114 = arith.constant 0 : index
    %208 = vector.load %arg3[%c17, %c0_113, %c0_114] : memref<18x32x32xf32, #tpu.memory_space<vmem>>, vector<1x32x32xf32>
    %209 = vector.shape_cast %208 : vector<1x32x32xf32> to vector<32x32xf32>
    %cst_115 = arith.constant dense<0.000000e+00> : vector<32x32xf32>
    %210 = tpu.matmul %200, %209, %cst_115 {dimension_numbers = #tpu.dot_dimension_numbers<[1], [0], [0], [1], [0, 0, 1, 1], [], []>} : vector<32x32xf32>, vector<32x32xf32>, vector<32x32xf32> -> vector<32x32xf32>
    %211 = arith.addf %207, %210 : vector<32x32xf32>
    %212 = vector.extract_strided_slice %9 {offsets = [5, 0], sizes = [1, 32], strides = [1, 1]} : vector<6x32xf32> to vector<1x32xf32>
    %213 = vector.broadcast %212 : vector<1x32xf32> to vector<32x32xf32>
    %214 = arith.addf %211, %213 : vector<32x32xf32>
    %215 = arith.addf %214, %152 : vector<32x32xf32>
    %c0_116 = arith.constant 0 : index
    %c0_117 = arith.constant 0 : index
    %216 = vector.load %arg9[%c0_116, %c0_117] : memref<32x32xf32, #tpu.memory_space<vmem>>, vector<32x32xf32>
    tpu.vector_store %arg9[%c0_116, %c0_117], %215 {strides = array<i32>} : memref<32x32xf32, #tpu.memory_space<vmem>>, vector<32x32xf32>,
    return
  }
}

</mosaic_0001>

<bundles_post_ra>
// kernel: tpu_custom_call.1
= control target key start
LH: loop header
LB: loop body
LE: loop exit
PB: predicated region body
PF: predicated region fallthrough
CT: control target
= control target key end

     0   :  { %14 = vsyncpa [#allocation3], 0  ;;  %s3789_s0 = inlined_call_operand.vmem [shape: f32[32,4], index: 0, kind: input, shape index: {}]   ;;  %s3790_s1 = inlined_call_operand.vmem [shape: f32[4,32], index: 1, kind: input, shape index: {}]   ;;  %s3791_s2 = inlined_call_operand.vmem [shape: f32[1,32], index: 2, kind: input, shape index: {}]   ;;  %s3792_s3 = inlined_call_operand.hbm [shape: f32[18,32,32], index: 3, kind: input, shape index: {}]   ;;  %s3793_s4 = inlined_call_operand.vmem [shape: f32[6,32], index: 4, kind: input, shape index: {}]   ;;  %s3794_s5 = inlined_call_operand.vmem [shape: f32[32,32], index: 5, kind: input, shape index: {}]   ;;  %s3795_s6 = inlined_call_operand.vmem [shape: f32[1,32], index: 6, kind: input, shape index: {}]   ;;  %s3796_s7 = inlined_call_operand.hbm [shape: f32[3,32,32], index: 7, kind: input, shape index: {}]   ;;  %s3797_s8 = inlined_call_operand.hbm [shape: f32[3,32,32], index: 8, kind: input, shape index: {}]   ;;  %s3798_s9 = inlined_call_operand.hbm [shape: f32[32,32], index: 9, kind: output, shape index: {}]  }
   0x1   :  { %15 = vsyncpa [#allocation6], 0 }
   0x2   :  { %16 = vsyncpa [#allocation4], 0  ;;  %s3289_s30 = smov [#allocation5]   ;;  %s3290_s11 = smov [#allocation2]  }
   0x3   :  { %s46_s10 = sshll.u32 %s3289_s30, 4  ;;  %s28_s12 = sshll.u32 %s3290_s11, 4  ;;  %s47_s10 = int_to_ptr.vmem [resolvable:$true] %s46_s10  ;;  %s29_s12 = int_to_ptr.vmem [resolvable:$true] %s28_s12 }
   0x4   :  { %s3211_s13 = scalar_lea.vmem %s47_s10, 1536  ;;  %p3216_p1 = scmp.lt.s32.totalorder %s47_s10, %s47_s10 }
   0x5   :  { %p3212_p0 = scmp.ne.s32.totalorder %s47_s10, %s3211_s13  ;;  %p3217_p2 = scmp.lt.s32.totalorder %s3211_s13, %s3211_s13 }
   0x7   :  { %p3218_p3 = por %p3217_p2, %p3216_p1 }
   0x9   :  { %p3219_p4 = pnand %p3218_p3, %p3212_p0 }
   0xb   :  { %3222 = shalt.err (!%p3219_p4)
}
   0xc   :  { %s3291_s14 = smov 128   ;;  %s3292_s15 = smov 8  }
   0xd   :  { %52 = dma.hbm_to_vmem [thread:$0]  %s3796_s7, 1536, %s47_s10, [#allocation6], %s3291_s14, %s3291_s14, %s3292_s15  }
   0xe   :  { %s3231_s18 = scalar_lea.vmem %s29_s12, 9216  ;;  %p3236_p6 = scmp.lt.s32.totalorder %s29_s12, %s29_s12 }
   0xf   :  { %p3232_p5 = scmp.ne.s32.totalorder %s29_s12, %s3231_s18  ;;  %p3237_p7 = scmp.lt.s32.totalorder %s3231_s18, %s3231_s18 }
  0x11   :  { %p3238_p8 = por %p3237_p7, %p3236_p6 }
  0x13   :  { %p3239_p9 = pnand %p3238_p8, %p3232_p5 }
  0x15   :  { %3242 = shalt.err (!%p3239_p9)
}
  0x16   :  { %34 = dma.hbm_to_vmem [thread:$0]  %s3792_s3, 9216, %s29_s12, [#allocation3], %s3291_s14, %s3291_s14, %s3292_s15  }
  0x17   :  { %s3293_s21 = smov [#allocation7]  }
  0x18   :  { %s58_s22 = sshll.u32 %s3293_s21, 4  ;;  %s59_s22 = int_to_ptr.vmem [resolvable:$true] %s58_s22 }
  0x19   :  { %s3251_s23 = scalar_lea.vmem %s59_s22, 1536  ;;  %p3256_p11 = scmp.lt.s32.totalorder %s59_s22, %s59_s22 }
  0x1a   :  { %p3252_p10 = scmp.ne.s32.totalorder %s59_s22, %s3251_s23  ;;  %p3257_p12 = scmp.lt.s32.totalorder %s3251_s23, %s3251_s23 }
  0x1c   :  { %p3258_p13 = por %p3257_p12, %p3256_p11 }
  0x1e   :  { %p3259_p0 = pnand %p3258_p13, %p3252_p10 }
  0x20   :  { %3262 = shalt.err (!%p3259_p0)
}
  0x21   :  { %64 = dma.hbm_to_vmem [thread:$0]  %s3797_s8, 1536, %s59_s22, [#allocation6], %s3291_s14, %s3291_s14, %s3292_s15  }
  0x22   :  { %3283 = dma.done.wait [#allocation3], 9216  }
  0x23   :  { %3284 = vsyncadd [#allocation3], 4294958080 }
  0x24   :  { %3285 = dma.done.wait [#allocation6], 3072  }
  0x25   :  { %3286 = vsyncadd [#allocation6], 4294964224  ;;  %vm99_vm0 = vcmask 1043456   ;;  %vm86_vm1 = vcmask 31744   ;;  %v78_v0 = vld [vmem:[%s3790_s1] sm:$0xf]  ;;  %v245_v48 = vlaneseq }
  0x26   :  { %v74_v1 = vld [vmem:[%s3789_s0] sm:$0xff]  ;;  %v75_v2 = vld [vmem:[%s3789_s0 + $0x8] sm:$0xff]  ;;  %2866 = vmatprep.subr.msk.mxu0 %vm99_vm0, %v78_v0  ;;  %v76_v3 = vld [vmem:[%s3789_s0 + $0x10] sm:$0xff]  ;;  %vm278_vm6 = vcmask 261120  }
  0x27   :  { %2868 = vmatprep.mubr.msk.f32.mxu0 %vm86_vm1, %v74_v1  ;;  %2867 = vmatpush3.msk.msra.mxu0 %vm99_vm0, %v78_v0  ;;  %v77_v4 = vld [vmem:[%s3789_s0 + $0x18] sm:$0xff]  ;;  %v276_v6 = vld [vmem:[#allocation2 + $0x30] sm:$0xff]  ;;  %v275_v8 = vld [vmem:[#allocation2 + $0x28] sm:$0xff]  ;;  %v3408_v54 = vshrl.u32 %v245_v48, 7 }
  0x28   :  { %2869 = vmatmul.mubr.msk.f32.vlgmr.msra.gmra.mxu0 %vm86_vm1, %v75_v2  ;;  %v277_v5 = vld [vmem:[#allocation2 + $0x38] sm:$0xff]  ;;  %v274_v9 = vld [vmem:[#allocation2 + $0x20] sm:$0xff]  ;;  %v271_v11 = vld [vmem:[#allocation2 + $0x10] sm:$0xff] }
  0x29   :  { %2871 = vmatprep.mubr.msk.f32.mxu0 %vm86_vm1, %v76_v3  ;;  %2874 = vmatprep.subr.mxu1 %v277_v5  ;;  %v272_v7 = vld [vmem:[#allocation2 + $0x18] sm:$0xff]  ;;  %v270_v12 = vld [vmem:[#allocation2 + $0x8] sm:$0xff]  ;;  %v269_v13 = vld [vmem:[#allocation2] sm:$0xff]  ;;  %vm260_vm7 = vcmp.lt.s32.totalorder %v3408_v54, 7  ;;  %vm247_vm8 = vcmp.lt.s32.totalorder %v3408_v54, 1  ;;  %vm1019_vm9 = vcmp.lt.s32.totalorder %v3408_v54, 2 }
  0x2a   :  { %2875 = vmatpush3.msra.mxu1 %v277_v5  ;;  %2888 = vmatprep.subr.mxu0 %v272_v7  ;;  %v3378_v10 = vld [vmem:[#allocation2 + $0x58] sm:$0xff]  ;;  %v2626_v14 = vld [vmem:[%s3791_s2] ss:$0 sm:$0xff]  ;;  %v476_v1 = vld [vmem:[#allocation2 + $0x50] sm:$0xff]  ;;  %vm1032_vm10 = vcmp.lt.s32.totalorder %v3408_v54, 6  ;;  %vm1899_vm11 = vcmp.lt.s32.totalorder %v3408_v54, 4 }
  0x2b   :  { %2876 = vmatprep.subr.mxu1 %v276_v6  ;;  %2889 = vmatpush3.msra.mxu0 %v272_v7  ;;  %v3414_v3 = vld [vmem:[#allocation7] sm:$0xff]  ;;  %v475_v7 = vld [vmem:[#allocation2 + $0x48] sm:$0xff] }
  0x2c   :  { %2872 = vmatmul.mubr.msk.f32.gmra.mxu0 %vm86_vm1, %v77_v4  ;;  %2877 = vmatpush3.msra.mxu1 %v276_v6  ;;  %v648_v48 = vld [vmem:[#allocation2 + $0x60] sm:$0xff] }
  0x2d   :  { %2878 = vmatprep.subr.mxu1 %v275_v8  ;;  %2890 = vmatprep.subr.mxu0 %v271_v11 }
  0x2e   :  { %2879 = vmatpush3.msra.mxu1 %v275_v8  ;;  %2891 = vmatpush3.msra.mxu0 %v271_v11 }
  0x2f   :  { %2880 = vmatprep.subr.mxu1 %v274_v9  ;;  %2892 = vmatprep.subr.mxu0 %v270_v12 }
  0x30   :  { %2881 = vmatpush3.msra.mxu1 %v274_v9  ;;  %2893 = vmatpush3.msra.mxu0 %v270_v12  ;;  %v3424_v12 = vld [vmem:[#allocation5] sm:$0xff] }
  0x31   :  { %2902 = vmatprep.subr.mxu1 %v3378_v10  ;;  %2894 = vmatprep.subr.mxu0 %v269_v13 }
  0x32   :  { %2895 = vmatpush3.msra.mxu0 %v269_v13  ;;  %v3426_v13 = vld [vmem:[#allocation5 + $0x8] sm:$0xff] }
  0xe8   :  { %v2870_v15 = vpop.f32.mrf.mxu0 }
  0xe9   :  { %v175_v16 = vadd.f32 %v2870_v15, %v2626_v14 }
  0xea   :  { %v169_v17 = vpop.f32.mrf.mxu0 }
  0xeb   :  { %vm189_vm2 = vcmp.ne.f32.partialorder %v175_v16, %v175_v16  ;;  %v170_v18 = vadd.f32 %v2626_v14, %v169_v17  ;;  %v474_v17 = vld [vmem:[#allocation2 + $0x40] sm:$0xff] }
  0xec   :  { %v3384_v19 = vsel %vm189_vm2, 0.0, %v175_v16  ;;  %v2873_v20 = vpop.f32.mrf.mxu0 }
  0xed   :  { %v206_v21 = vmul.f32 %v3384_v19, %v3384_v19  ;;  %vm188_vm3 = vcmp.ne.f32.partialorder %v170_v18, %v170_v18  ;;  %v185_v22 = vadd.f32 %v2873_v20, %v2626_v14  ;;  %v3433_v20 = vld [vmem:[#allocation7 + $0x8] sm:$0xff] }
  0xee   :  { %v3388_v23 = vsel %vm188_vm3, 0.0, %v170_v18  ;;  %v179_v24 = vpop.f32.mrf.mxu0  ;;  %v3431_v18 = vld [vmem:[#allocation5 + $0x10] sm:$0xff] }
  0xef   :  { %v210_v25 = vmul.f32 %v206_v21, %v3384_v19  ;;  %v205_v26 = vmul.f32 %v3388_v23, %v3388_v23  ;;  %vm191_vm4 = vcmp.ne.f32.partialorder %v185_v22, %v185_v22  ;;  %v180_v27 = vadd.f32 %v2626_v14, %v179_v24 }
  0xf0   :  { %v3393_v28 = vsel %vm191_vm4, 0.0, %v185_v22  ;;  %v3438_v22 = vld [vmem:[#allocation7 + $0x10] sm:$0xff] }
  0xf1   :  { %v214_v29 = vmul.f32 0.044715, %v210_v25  ;;  %v209_v30 = vmul.f32 %v205_v26, %v3388_v23  ;;  %v208_v31 = vmul.f32 %v3393_v28, %v3393_v28  ;;  %vm190_vm5 = vcmp.ne.f32.partialorder %v180_v27, %v180_v27 }
  0xf2   :  { %v3398_v32 = vsel %vm190_vm5, 0.0, %v180_v27 }
  0xf3   :  { %v218_v33 = vadd.f32 %v214_v29, %v3384_v19  ;;  %v213_v34 = vmul.f32 0.044715, %v209_v30  ;;  %v212_v35 = vmul.f32 %v208_v31, %v3393_v28  ;;  %v207_v36 = vmul.f32 %v3398_v32, %v3398_v32 }
  0xf5   :  { %v222_v37 = vmul.f32 0.7978846, %v218_v33  ;;  %v217_v38 = vadd.f32 %v213_v34, %v3388_v23  ;;  %v216_v39 = vmul.f32 0.044715, %v212_v35  ;;  %v211_v40 = vmul.f32 %v207_v36, %v3398_v32  ;;  %v3453_v34 = vld [vmem:[#allocation5 + $0x18] sm:$0xff] }
  0xf6   :  { %v3457_v36 = vld [vmem:[#allocation7 + $0x18] sm:$0xff] }
  0xf7   :  { %3154 = vtanh.f32 %v222_v37  ;;  %v221_v41 = vmul.f32 0.7978846, %v217_v38  ;;  %v220_v42 = vadd.f32 %v216_v39, %v3393_v28  ;;  %v215_v43 = vmul.f32 0.044715, %v211_v40  ;;  %v656_v40 = vld [vmem:[#allocation2 + $0x98] sm:$0xff] }
  0xf8   :  { %2916 = vmatprep.subr.mxu0 %v656_v40 }
  0xf9   :  { %3156 = vtanh.f32 %v221_v41  ;;  %v224_v44 = vmul.f32 0.7978846, %v220_v42  ;;  %v219_v45 = vadd.f32 %v215_v43, %v3398_v32  ;;  %v655_v41 = vld [vmem:[#allocation2 + $0x90] sm:$0xff]  ;;  %v654_v42 = vld [vmem:[#allocation2 + $0x88] sm:$0xff]  ;;  %v653_v43 = vld [vmem:[#allocation2 + $0x80] sm:$0xff] }
  0xfb   :  { %3158 = vtanh.f32 %v224_v44  ;;  %v223_v46 = vmul.f32 0.7978846, %v219_v45  ;;  %v651_v44 = vld [vmem:[#allocation2 + $0x78] sm:$0xff]  ;;  %v650_v45 = vld [vmem:[#allocation2 + $0x70] sm:$0xff] }
  0xfd   :  { %3160 = vtanh.f32 %v223_v46  ;;  %v3469_v46 = vld [vmem:[#allocation2 + $0xb8] sm:$0xff] }
 0x104   :  { %v3155_v47 = vpop.eup %3154 }
 0x105   :  { %v230_v49 = vadd.f32 1.0, %v3155_v47  ;;  %v649_v47 = vld [vmem:[#allocation2 + $0x68] sm:$0xff] }
 0x106   :  { %v3157_v50 = vpop.eup %3156 }
 0x107   :  { %v229_v51 = vadd.f32 1.0, %v3157_v50  ;;  %v234_v52 = vmul.f32 0.5, %v230_v49 }
 0x108   :  { %v3159_v53 = vpop.eup %3158 }
 0x109   :  { %v233_v55 = vmul.f32 0.5, %v229_v51  ;;  %v238_v56 = vmul.f32 %v234_v52, %v3384_v19  ;;  %v232_v57 = vadd.f32 1.0, %v3159_v53  ;;  %v581_v52 = vsub.s32 0, %v3408_v54 }
 0x10a   :  { %v3161_v58 = vpop.eup %3160 }
 0x10b   :  { %v237_v59 = vmul.f32 %v233_v55, %v3388_v23  ;;  %v231_v60 = vadd.f32 1.0, %v3161_v58  ;;  %v236_v61 = vmul.f32 0.5, %v232_v57  ;;  %v257_v0 = vrot.slane %v238_v56, 1  ;;  %v3476_v55 = vld [vmem:[%s3793_s4] sm:$0x3f] }
 0x10c   :  { %v242_v5 = vrot.slane %v238_v56, 7 }
 0x10d   :  { %v241_v62 = vrot.slane %v237_v59, 7  ;;  %v256_v63 = vrot.slane %v237_v59, 1  ;;  %2882 = vmatprep.mubr.msk.f32.mxu1 %vm278_vm6, %v237_v59  ;;  %v235_v2 = vmul.f32 0.5, %v231_v60  ;;  %v240_v4 = vmul.f32 %v236_v61, %v3393_v28 }
 0x10e   :  { %2883 = vmatmul.mubr.msk.f32.vlgmr.msra.gmra.mxu1 %vm278_vm6, %v238_v56  ;;  %v582_v59 = vrot.slane %v3476_v55, %v581_v52 }
 0x10f   :  { %2903 = vmatpush3.msra.mxu1 %v3378_v10  ;;  %v239_v6 = vmul.f32 %v235_v2, %v3398_v32  ;;  %v263_v8 = vsel %vm260_vm7, %v256_v63, %v257_v0  ;;  %v244_v9 = vrot.slane %v240_v4, 7  ;;  %v250_v14 = vsel %vm247_vm8, %v241_v62, %v242_v5 }
 0x110   :  { %2904 = vmatprep.subr.mxu1 %v476_v1  ;;  %v265_v11 = vmul.f32 %v263_v8, %v3414_v3  ;;  %v259_v10 = vrot.slane %v240_v4, 1  ;;  %v253_v27 = vmul.f32 %v250_v14, %v3426_v13 }
 0x111   :  { %v243_v15 = vrot.slane %v239_v6, 7  ;;  %v258_v16 = vrot.slane %v239_v6, 1  ;;  %2885 = vmatprep.mubr.msk.f32.mxu1 %vm278_vm6, %v239_v6  ;;  %2905 = vmatpush3.msra.mxu1 %v476_v1  ;;  %v251_v21 = vsel %vm247_vm8, %v244_v9, %v241_v62 }
 0x112   :  { %2886 = vmatmul.mubr.msk.f32.gmra.mxu1 %vm278_vm6, %v240_v4  ;;  %2906 = vmatprep.subr.mxu1 %v475_v7  ;;  %v252_v25 = vmul.f32 %v251_v21, %v3424_v12  ;;  %v264_v37 = vsel %vm260_vm7, %v259_v10, %v256_v63 }
 0x113   :  { %v262_v24 = vsel %vm260_vm7, %v257_v0, %v258_v16  ;;  %2907 = vmatpush3.msra.mxu1 %v475_v7  ;;  %2910 = vmatprep.mubr.msk.f32.mxu1 %vm278_vm6, %v265_v11  ;;  %v249_v26 = vsel %vm247_vm8, %v242_v5, %v243_v15  ;;  %v261_v31 = vsel %vm260_vm7, %v258_v16, %v259_v10 }
 0x114   :  { %2908 = vmatprep.subr.mxu1 %v474_v17  ;;  %v254_v29 = vmul.f32 %v249_v26, %v3431_v18  ;;  %v266_v30 = vmul.f32 %v262_v24, %v3433_v20  ;;  %2896 = vmatprep.mubr.msk.f32.mxu0 %vm278_vm6, %v252_v25  ;;  %v267_v33 = vmul.f32 %v261_v31, %v3438_v22 }
 0x115   :  { %2909 = vmatpush3.msra.mxu1 %v474_v17  ;;  %v248_v35 = vsel %vm247_vm8, %v243_v15, %v244_v9  ;;  %2897 = vmatmul.mubr.msk.f32.vlgmr.msra.gmra.mxu0 %vm278_vm6, %v253_v27  ;;  %v268_v39 = vmul.f32 %v264_v37, %v3457_v36 }
 0x116   :  { %2911 = vmatmul.mubr.msk.f32.vlgmr.msra.gmra.mxu1 %vm278_vm6, %v266_v30  ;;  %2899 = vmatprep.mubr.msk.f32.mxu0 %vm278_vm6, %v254_v29  ;;  %v255_v38 = vmul.f32 %v248_v35, %v3453_v34 }
 0x117   :  { %2913 = vmatprep.mubr.msk.f32.mxu1 %vm278_vm6, %v267_v33  ;;  %2917 = vmatpush3.msra.mxu0 %v656_v40 }
 0x118   :  { %2918 = vmatprep.subr.mxu0 %v655_v41  ;;  %2930 = vmatprep.subr.mxu1 %v651_v44 }
 0x119   :  { %2900 = vmatmul.mubr.msk.f32.gmra.mxu0 %vm278_vm6, %v255_v38  ;;  %2931 = vmatpush3.msra.mxu1 %v651_v44 }
 0x11a   :  { %2914 = vmatmul.mubr.msk.f32.gmra.mxu1 %vm278_vm6, %v268_v39  ;;  %2919 = vmatpush3.msra.mxu0 %v655_v41 }
 0x11b   :  { %2920 = vmatprep.subr.mxu0 %v654_v42  ;;  %2932 = vmatprep.subr.mxu1 %v650_v45 }
 0x11c   :  { %2921 = vmatpush3.msra.mxu0 %v654_v42  ;;  %2933 = vmatpush3.msra.mxu1 %v650_v45 }
 0x11d   :  { %2922 = vmatprep.subr.mxu0 %v653_v43  ;;  %2934 = vmatprep.subr.mxu1 %v649_v47 }
 0x11e   :  { %2923 = vmatpush3.msra.mxu0 %v653_v43  ;;  %2935 = vmatpush3.msra.mxu1 %v649_v47 }
 0x11f   :  { %2944 = vmatprep.subr.mxu0 %v3469_v46  ;;  %2936 = vmatprep.subr.mxu1 %v648_v48 }
 0x120   :  { %2937 = vmatpush3.msra.mxu1 %v648_v48 }
 0x1ce   :  { %v2884_v49 = vpop.f32.mrf.mxu1 }
 0x1d0   :  { %v357_v50 = vpop.f32.mrf.mxu1 }
 0x1d2   :  { %v2887_v51 = vpop.f32.mrf.mxu1 }
 0x1d4   :  { %v367_v53 = vpop.f32.mrf.mxu1 }
 0x1d5   :  { %v2898_v56 = vpop.f32.mrf.mxu0 }
 0x1d6   :  { %v2912_v57 = vpop.f32.mrf.mxu1  ;;  %v460_v58 = vadd.f32 %v2898_v56, %v2884_v49 }
 0x1d7   :  { %v454_v60 = vpop.f32.mrf.mxu0 }
 0x1d8   :  { %v556_v61 = vpop.f32.mrf.mxu1  ;;  %v576_v62 = vadd.f32 %v2912_v57, %v460_v58  ;;  %v455_v63 = vadd.f32 %v454_v60, %v357_v50 }
 0x1d9   :  { %v2901_v0 = vpop.f32.mrf.mxu0 }
 0x1da   :  { %v2915_v1 = vpop.f32.mrf.mxu1  ;;  %v584_v2 = vadd.f32 %v582_v59, %v576_v62  ;;  %v575_v4 = vadd.f32 %v556_v61, %v455_v63  ;;  %v470_v5 = vadd.f32 %v2901_v0, %v2887_v51  ;;  %v854_v0 = vld [vmem:[#allocation2 + $0xb0] sm:$0xff] }
 0x1db   :  { %v464_v6 = vpop.f32.mrf.mxu0 }
 0x1dc   :  { %v566_v7 = vpop.f32.mrf.mxu1  ;;  %v588_v8 = vmul.f32 %v584_v2, %v584_v2  ;;  %v583_v9 = vadd.f32 %v582_v59, %v575_v4  ;;  %v578_v11 = vadd.f32 %v2915_v1, %v470_v5  ;;  %v465_v14 = vadd.f32 %v464_v6, %v367_v53 }
 0x1de   :  { %v592_v15 = vmul.f32 %v588_v8, %v584_v2  ;;  %v587_v16 = vmul.f32 %v583_v9, %v583_v9  ;;  %v586_v10 = vadd.f32 %v582_v59, %v578_v11  ;;  %v577_v17 = vadd.f32 %v566_v7, %v465_v14  ;;  %v853_v8 = vld [vmem:[#allocation2 + $0xa8] sm:$0xff] }
 0x1e0   :  { %v596_v21 = vmul.f32 0.044715, %v592_v15  ;;  %v591_v24 = vmul.f32 %v587_v16, %v583_v9  ;;  %v590_v25 = vmul.f32 %v586_v10, %v586_v10  ;;  %v585_v26 = vadd.f32 %v582_v59, %v577_v17  ;;  %v852_v17 = vld [vmem:[#allocation2 + $0xa0] sm:$0xff] }
 0x1e2   :  { %v600_v27 = vadd.f32 %v596_v21, %v584_v2  ;;  %v595_v29 = vmul.f32 0.044715, %v591_v24  ;;  %v594_v30 = vmul.f32 %v590_v25, %v586_v10  ;;  %v589_v31 = vmul.f32 %v585_v26, %v585_v26 }
 0x1e4   :  { %v604_v33 = vmul.f32 0.7978846, %v600_v27  ;;  %v599_v35 = vadd.f32 %v595_v29, %v583_v9  ;;  %v598_v37 = vmul.f32 0.044715, %v594_v30  ;;  %v593_v38 = vmul.f32 %v589_v31, %v585_v26  ;;  %v1049_v30 = vld [vmem:[#allocation2 + $0xf0] sm:$0xff]  ;;  %v1048_v31 = vld [vmem:[#allocation2 + $0xe8] sm:$0xff] }
 0x1e6   :  { %3162 = vtanh.f32 %v604_v33  ;;  %v603_v39 = vmul.f32 0.7978846, %v599_v35  ;;  %v602_v40 = vadd.f32 %v598_v37, %v586_v10  ;;  %v597_v41 = vmul.f32 0.044715, %v593_v38  ;;  %v1045_v33 = vld [vmem:[#allocation2 + $0xd8] sm:$0xff]  ;;  %v1047_v35 = vld [vmem:[#allocation2 + $0xe0] sm:$0xff] }
 0x1e7   :  { %v1043_v37 = vld [vmem:[#allocation2 + $0xc8] sm:$0xff]  ;;  %v1042_v38 = vld [vmem:[#allocation2 + $0xc0] sm:$0xff] }
 0x1e8   :  { %3164 = vtanh.f32 %v603_v39  ;;  %v606_v42 = vmul.f32 0.7978846, %v602_v40  ;;  %v601_v43 = vadd.f32 %v597_v41, %v585_v26 }
 0x1ea   :  { %3166 = vtanh.f32 %v606_v42  ;;  %v605_v44 = vmul.f32 0.7978846, %v601_v43  ;;  %v959_v42 = vsub.s32 1, %v3408_v54 }
 0x1ec   :  { %3168 = vtanh.f32 %v605_v44 }
 0x1f3   :  { %v3163_v45 = vpop.eup %3162 }
 0x1f4   :  { %v612_v47 = vadd.f32 1.0, %v3163_v45 }
 0x1f5   :  { %v3165_v48 = vpop.eup %3164 }
 0x1f6   :  { %v616_v49 = vmul.f32 0.5, %v612_v47  ;;  %v611_v50 = vadd.f32 1.0, %v3165_v48  ;;  %v960_v48 = vrot.slane %v3476_v55, %v959_v42 }
 0x1f7   :  { %v3167_v51 = vpop.eup %3166 }
 0x1f8   :  { %v620_v52 = vmul.f32 %v616_v49, %v584_v2  ;;  %v615_v53 = vmul.f32 0.5, %v611_v50  ;;  %v614_v56 = vadd.f32 1.0, %v3167_v51 }
 0x1f9   :  { %v3169_v57 = vpop.eup %3168 }
 0x1fa   :  { %v619_v58 = vmul.f32 %v615_v53, %v583_v9  ;;  %v613_v59 = vadd.f32 1.0, %v3169_v57  ;;  %v618_v60 = vmul.f32 0.5, %v614_v56  ;;  %v624_v61 = vrot.slane %v620_v52, 7 }
 0x1fb   :  { %v636_v5 = vrot.slane %v620_v52, 1 }
 0x1fc   :  { %v623_v62 = vrot.slane %v619_v58, 7  ;;  %v635_v63 = vrot.slane %v619_v58, 1  ;;  %2924 = vmatprep.mubr.msk.f32.mxu0 %vm278_vm6, %v619_v58  ;;  %v617_v1 = vmul.f32 0.5, %v613_v59  ;;  %v622_v4 = vmul.f32 %v618_v60, %v586_v10 }
 0x1fd   :  { %2925 = vmatmul.mubr.msk.f32.vlgmr.msra.gmra.mxu0 %vm278_vm6, %v620_v52 }
 0x1fe   :  { %v629_v2 = vsel %vm247_vm8, %v623_v62, %v624_v61  ;;  %2945 = vmatpush3.msra.mxu0 %v3469_v46  ;;  %v621_v6 = vmul.f32 %v617_v1, %v585_v26  ;;  %v626_v7 = vrot.slane %v622_v4, 7  ;;  %v638_v9 = vrot.slane %v622_v4, 1 }
 0x1ff   :  { %2946 = vmatprep.subr.mxu0 %v854_v0  ;;  %v641_v11 = vsel %vm260_vm7, %v635_v63, %v636_v5  ;;  %v632_v21 = vmul.f32 %v629_v2, %v3426_v13 }
 0x200   :  { %v625_v14 = vrot.slane %v621_v6, 7  ;;  %v637_v15 = vrot.slane %v621_v6, 1  ;;  %2927 = vmatprep.mubr.msk.f32.mxu0 %vm278_vm6, %v621_v6  ;;  %2947 = vmatpush3.msra.mxu0 %v854_v0  ;;  %v643_v16 = vmul.f32 %v641_v11, %v3414_v3  ;;  %v630_v10 = vsel %vm247_vm8, %v626_v7, %v623_v62 }
 0x201   :  { %2928 = vmatmul.mubr.msk.f32.gmra.mxu0 %vm278_vm6, %v622_v4  ;;  %2948 = vmatprep.subr.mxu0 %v853_v8  ;;  %v631_v46 = vmul.f32 %v630_v10, %v3424_v12  ;;  %v642_v29 = vsel %vm260_vm7, %v638_v9, %v635_v63 }
 0x202   :  { %2949 = vmatpush3.msra.mxu0 %v853_v8  ;;  %v640_v24 = vsel %vm260_vm7, %v636_v5, %v637_v15  ;;  %2952 = vmatprep.mubr.msk.f32.mxu0 %vm278_vm6, %v643_v16  ;;  %v628_v3 = vsel %vm247_vm8, %v624_v61, %v625_v14  ;;  %v639_v25 = vsel %vm260_vm7, %v637_v15, %v638_v9 }
 0x203   :  { %2938 = vmatprep.mubr.msk.f32.mxu1 %vm278_vm6, %v631_v46  ;;  %2950 = vmatprep.subr.mxu0 %v852_v17  ;;  %v633_v26 = vmul.f32 %v628_v3, %v3431_v18  ;;  %v644_v12 = vmul.f32 %v640_v24, %v3433_v20  ;;  %v645_v13 = vmul.f32 %v639_v25, %v3438_v22  ;;  %v1050_v22 = vld [vmem:[#allocation2 + $0xf8] sm:$0xff] }
 0x204   :  { %2939 = vmatmul.mubr.msk.f32.vlgmr.msra.gmra.mxu1 %vm278_vm6, %v632_v21  ;;  %2951 = vmatpush3.msra.mxu0 %v852_v17  ;;  %v627_v27 = vsel %vm247_vm8, %v625_v14, %v626_v7  ;;  %v646_v20 = vmul.f32 %v642_v29, %v3457_v36  ;;  %v3516_v36 = vld [vmem:[#allocation2 + $0x118] sm:$0xff] }
 0x205   :  { %2941 = vmatprep.mubr.msk.f32.mxu1 %vm278_vm6, %v633_v26  ;;  %2953 = vmatmul.mubr.msk.f32.vlgmr.msra.gmra.mxu0 %vm278_vm6, %v644_v12  ;;  %v634_v18 = vmul.f32 %v627_v27, %v3453_v34  ;;  %v1044_v34 = vld [vmem:[#allocation2 + $0xd0] sm:$0xff] }
 0x206   :  { %2955 = vmatprep.mubr.msk.f32.mxu0 %vm278_vm6, %v645_v13  ;;  %2958 = vmatprep.subr.mxu1 %v1050_v22 }
 0x207   :  { %2959 = vmatpush3.msra.mxu1 %v1050_v22  ;;  %2972 = vmatprep.subr.mxu0 %v1045_v33 }
 0x208   :  { %2942 = vmatmul.mubr.msk.f32.gmra.mxu1 %vm278_vm6, %v634_v18  ;;  %2960 = vmatprep.subr.mxu1 %v1049_v30 }
 0x209   :  { %2956 = vmatmul.mubr.msk.f32.gmra.mxu0 %vm278_vm6, %v646_v20  ;;  %2961 = vmatpush3.msra.mxu1 %v1049_v30 }
 0x20a   :  { %2973 = vmatpush3.msra.mxu0 %v1045_v33  ;;  %2962 = vmatprep.subr.mxu1 %v1048_v31 }
 0x20b   :  { %2963 = vmatpush3.msra.mxu1 %v1048_v31  ;;  %2974 = vmatprep.subr.mxu0 %v1044_v34 }
 0x20c   :  { %2964 = vmatprep.subr.mxu1 %v1047_v35  ;;  %2975 = vmatpush3.msra.mxu0 %v1044_v34 }
 0x20d   :  { %2965 = vmatpush3.msra.mxu1 %v1047_v35  ;;  %2976 = vmatprep.subr.mxu0 %v1043_v37 }
 0x20e   :  { %2986 = vmatprep.subr.mxu1 %v3516_v36  ;;  %2977 = vmatpush3.msra.mxu0 %v1043_v37 }
 0x20f   :  { %2978 = vmatprep.subr.mxu0 %v1042_v38 }
 0x210   :  { %2979 = vmatpush3.msra.mxu0 %v1042_v38 }
 0x2bd   :  { %v2926_v39 = vpop.f32.mrf.mxu0 }
 0x2bf   :  { %v735_v40 = vpop.f32.mrf.mxu0 }
 0x2c1   :  { %v2929_v41 = vpop.f32.mrf.mxu0 }
 0x2c3   :  { %v745_v43 = vpop.f32.mrf.mxu0 }
 0x2c4   :  { %v2940_v44 = vpop.f32.mrf.mxu1 }
 0x2c5   :  { %v838_v45 = vadd.f32 %v2940_v44, %v2926_v39  ;;  %v2954_v47 = vpop.f32.mrf.mxu0  ;;  %v1248_v44 = vld [vmem:[#allocation2 + $0x110] sm:$0xff] }
 0x2c6   :  { %v832_v49 = vpop.f32.mrf.mxu1 }
 0x2c7   :  { %v954_v50 = vadd.f32 %v2954_v47, %v838_v45  ;;  %v833_v51 = vadd.f32 %v832_v49, %v735_v40  ;;  %v934_v52 = vpop.f32.mrf.mxu0 }
 0x2c8   :  { %v2943_v53 = vpop.f32.mrf.mxu1 }
 0x2c9   :  { %v962_v56 = vadd.f32 %v960_v48, %v954_v50  ;;  %v953_v57 = vadd.f32 %v934_v52, %v833_v51  ;;  %v848_v58 = vadd.f32 %v2943_v53, %v2929_v41  ;;  %v2957_v59 = vpop.f32.mrf.mxu0  ;;  %v1247_v53 = vld [vmem:[#allocation2 + $0x108] sm:$0xff] }
 0x2ca   :  { %v842_v60 = vpop.f32.mrf.mxu1 }
 0x2cb   :  { %v3522_v61 = vadd.f32 %v962_v56, %v3384_v19  ;;  %v961_v62 = vadd.f32 %v960_v48, %v953_v57  ;;  %v956_v63 = vadd.f32 %v2957_v59, %v848_v58  ;;  %v843_v0 = vadd.f32 %v842_v60, %v745_v43  ;;  %v944_v1 = vpop.f32.mrf.mxu0  ;;  %v3562_v56 = vld [vmem:[#allocation5 + $0x20] sm:$0xff]  ;;  %v3564_v57 = vld [vmem:[#allocation5 + $0x28] sm:$0xff] }
 0x2cc   :  { %v1246_v60 = vld [vmem:[#allocation2 + $0x100] sm:$0xff] }
 0x2cd   :  { %v980_v4 = vmul.f32 %v3522_v61, %v3522_v61  ;;  %v3527_v5 = vadd.f32 %v961_v62, %v3388_v23  ;;  %v964_v2 = vadd.f32 %v960_v48, %v956_v63  ;;  %v955_v6 = vadd.f32 %v944_v1, %v843_v0  ;;  %v3572_v1 = vld [vmem:[#allocation5 + $0x30] sm:$0xff] }
 0x2cf   :  { %v984_v7 = vmul.f32 %v980_v4, %v3522_v61  ;;  %v979_v8 = vmul.f32 %v3527_v5, %v3527_v5  ;;  %v3533_v19 = vadd.f32 %v964_v2, %v3393_v28  ;;  %v963_v9 = vadd.f32 %v960_v48, %v955_v6  ;;  %v3556_v48 = vld [vmem:[#allocation7 + $0x20] sm:$0xff]  ;;  %v3574_v4 = vld [vmem:[#allocation7 + $0x28] sm:$0xff]  ;;  %v3576_v2 = vld [vmem:[#allocation7 + $0x30] sm:$0xff] }
 0x2d1   :  { %v988_v11 = vmul.f32 0.044715, %v984_v7  ;;  %v982_v14 = vmul.f32 %v3533_v19, %v3533_v19  ;;  %v3538_v15 = vadd.f32 %v963_v9, %v3398_v32  ;;  %v983_v23 = vmul.f32 %v979_v8, %v3527_v5 }
 0x2d3   :  { %v992_v16 = vadd.f32 %v988_v11, %v3522_v61  ;;  %v981_v10 = vmul.f32 %v3538_v15, %v3538_v15  ;;  %v987_v17 = vmul.f32 0.044715, %v983_v23  ;;  %v986_v46 = vmul.f32 %v982_v14, %v3533_v19 }
 0x2d5   :  { %v996_v28 = vmul.f32 0.7978846, %v992_v16  ;;  %v991_v21 = vadd.f32 %v987_v17, %v3527_v5  ;;  %v985_v24 = vmul.f32 %v981_v10, %v3538_v15  ;;  %v990_v3 = vmul.f32 0.044715, %v986_v46  ;;  %v3592_v10 = vld [vmem:[#allocation5 + $0x38] sm:$0xff] }
 0x2d6   :  { %v3597_v46 = vld [vmem:[#allocation7 + $0x38] sm:$0xff] }
 0x2d7   :  { %3170 = vtanh.f32 %v996_v28  ;;  %v995_v25 = vmul.f32 0.7978846, %v991_v21  ;;  %v989_v32 = vmul.f32 0.044715, %v985_v24  ;;  %v994_v26 = vadd.f32 %v990_v3, %v3533_v19  ;;  %v1428_v3 = vld [vmem:[#allocation2 + $0x158] sm:$0xff] }
 0x2d8   :  { %3000 = vmatprep.subr.mxu0 %v1428_v3 }
 0x2d9   :  { %3172 = vtanh.f32 %v995_v25  ;;  %v993_v12 = vadd.f32 %v989_v32, %v3538_v15  ;;  %v998_v13 = vmul.f32 0.7978846, %v994_v26  ;;  %v1427_v25 = vld [vmem:[#allocation2 + $0x150] sm:$0xff]  ;;  %v1426_v32 = vld [vmem:[#allocation2 + $0x148] sm:$0xff]  ;;  %v1423_v26 = vld [vmem:[#allocation2 + $0x138] sm:$0xff] }
 0x2db   :  { %v997_v27 = vmul.f32 0.7978846, %v993_v12  ;;  %3174 = vtanh.f32 %v998_v13  ;;  %v1425_v12 = vld [vmem:[#allocation2 + $0x140] sm:$0xff]  ;;  %v1422_v13 = vld [vmem:[#allocation2 + $0x130] sm:$0xff] }
 0x2dd   :  { %3176 = vtanh.f32 %v997_v27  ;;  %v3608_v27 = vld [vmem:[#allocation2 + $0x178] sm:$0xff] }
 0x2e4   :  { %v3171_v29 = vpop.eup %3170 }
 0x2e5   :  { %v1004_v18 = vadd.f32 1.0, %v3171_v29  ;;  %v1421_v29 = vld [vmem:[#allocation2 + $0x128] sm:$0xff] }
 0x2e6   :  { %v3173_v20 = vpop.eup %3172 }
 0x2e7   :  { %v1008_v22 = vmul.f32 0.5, %v1004_v18  ;;  %v1003_v30 = vadd.f32 1.0, %v3173_v20  ;;  %v1420_v18 = vld [vmem:[#allocation2 + $0x120] sm:$0xff] }
 0x2e8   :  { %v3175_v31 = vpop.eup %3174 }
 0x2e9   :  { %v1012_v33 = vmul.f32 %v1008_v22, %v3522_v61  ;;  %v1007_v35 = vmul.f32 0.5, %v1003_v30  ;;  %v1006_v34 = vadd.f32 1.0, %v3175_v31  ;;  %v1353_v31 = vsub.s32 2, %v3408_v54 }
 0x2ea   :  { %v3177_v37 = vpop.eup %3176 }
 0x2eb   :  { %v1011_v38 = vmul.f32 %v1007_v35, %v3527_v5  ;;  %v1005_v39 = vadd.f32 1.0, %v3177_v37  ;;  %v1010_v40 = vmul.f32 0.5, %v1006_v34  ;;  %v1016_v41 = vrot.slane %v1012_v33, 6 }
 0x2ec   :  { %v1029_v49 = vrot.slane %v1012_v33, 2 }
 0x2ed   :  { %v1015_v42 = vrot.slane %v1011_v38, 6  ;;  %v1028_v43 = vrot.slane %v1011_v38, 2  ;;  %2966 = vmatprep.mubr.msk.f32.mxu1 %vm278_vm6, %v1011_v38  ;;  %v1009_v45 = vmul.f32 0.5, %v1005_v39  ;;  %v1014_v47 = vmul.f32 %v1010_v40, %v3533_v19 }
 0x2ee   :  { %2967 = vmatmul.mubr.msk.f32.vlgmr.msra.gmra.mxu1 %vm278_vm6, %v1012_v33  ;;  %v1354_v38 = vrot.slane %v3476_v55, %v1353_v31 }
 0x2ef   :  { %v1022_v50 = vsel %vm1019_vm9, %v1015_v42, %v1016_v41  ;;  %2987 = vmatpush3.msra.mxu1 %v3516_v36  ;;  %v1013_v51 = vmul.f32 %v1009_v45, %v3538_v15  ;;  %v1018_v52 = vrot.slane %v1014_v47, 6  ;;  %v1031_v58 = vrot.slane %v1014_v47, 2 }
 0x2f0   :  { %2988 = vmatprep.subr.mxu1 %v1248_v44  ;;  %v1035_v59 = vsel %vm1032_vm10, %v1028_v43, %v1029_v49  ;;  %v1025_v7 = vmul.f32 %v1022_v50, %v3564_v57 }
 0x2f1   :  { %v1017_v62 = vrot.slane %v1013_v51, 6  ;;  %v1030_v63 = vrot.slane %v1013_v51, 2  ;;  %2969 = vmatprep.mubr.msk.f32.mxu1 %vm278_vm6, %v1013_v51  ;;  %2989 = vmatpush3.msra.mxu1 %v1248_v44  ;;  %v1037_v36 = vmul.f32 %v1035_v59, %v3556_v48  ;;  %v1023_v0 = vsel %vm1019_vm9, %v1018_v52, %v1015_v42 }
 0x2f2   :  { %2970 = vmatmul.mubr.msk.f32.gmra.mxu1 %vm278_vm6, %v1014_v47  ;;  %2990 = vmatprep.subr.mxu1 %v1247_v53  ;;  %v1024_v6 = vmul.f32 %v1023_v0, %v3562_v56  ;;  %v1036_v28 = vsel %vm1032_vm10, %v1031_v58, %v1028_v43 }
 0x2f3   :  { %2991 = vmatpush3.msra.mxu1 %v1247_v53  ;;  %v1034_v8 = vsel %vm1032_vm10, %v1029_v49, %v1030_v63  ;;  %2994 = vmatprep.mubr.msk.f32.mxu1 %vm278_vm6, %v1037_v36  ;;  %v1021_v9 = vsel %vm1019_vm9, %v1016_v41, %v1017_v62  ;;  %v1033_v11 = vsel %vm1032_vm10, %v1030_v63, %v1031_v58 }
 0x2f4   :  { %2980 = vmatprep.mubr.msk.f32.mxu0 %vm278_vm6, %v1024_v6  ;;  %2992 = vmatprep.subr.mxu1 %v1246_v60  ;;  %v1026_v14 = vmul.f32 %v1021_v9, %v3572_v1  ;;  %v1038_v23 = vmul.f32 %v1034_v8, %v3574_v4  ;;  %v1039_v16 = vmul.f32 %v1033_v11, %v3576_v2 }
 0x2f5   :  { %2981 = vmatmul.mubr.msk.f32.vlgmr.msra.gmra.mxu0 %vm278_vm6, %v1025_v7  ;;  %2993 = vmatpush3.msra.mxu1 %v1246_v60  ;;  %v1020_v17 = vsel %vm1019_vm9, %v1017_v62, %v1018_v52  ;;  %v1040_v24 = vmul.f32 %v1036_v28, %v3597_v46 }
 0x2f6   :  { %2983 = vmatprep.mubr.msk.f32.mxu0 %vm278_vm6, %v1026_v14  ;;  %2995 = vmatmul.mubr.msk.f32.vlgmr.msra.gmra.mxu1 %vm278_vm6, %v1038_v23  ;;  %v1027_v21 = vmul.f32 %v1020_v17, %v3592_v10 }
 0x2f7   :  { %2997 = vmatprep.mubr.msk.f32.mxu1 %vm278_vm6, %v1039_v16  ;;  %3001 = vmatpush3.msra.mxu0 %v1428_v3 }
 0x2f8   :  { %3002 = vmatprep.subr.mxu0 %v1427_v25  ;;  %3014 = vmatprep.subr.mxu1 %v1423_v26 }
 0x2f9   :  { %2984 = vmatmul.mubr.msk.f32.gmra.mxu0 %vm278_vm6, %v1027_v21  ;;  %3015 = vmatpush3.msra.mxu1 %v1423_v26 }
 0x2fa   :  { %2998 = vmatmul.mubr.msk.f32.gmra.mxu1 %vm278_vm6, %v1040_v24  ;;  %3003 = vmatpush3.msra.mxu0 %v1427_v25 }
 0x2fb   :  { %3004 = vmatprep.subr.mxu0 %v1426_v32  ;;  %3016 = vmatprep.subr.mxu1 %v1422_v13 }
 0x2fc   :  { %3005 = vmatpush3.msra.mxu0 %v1426_v32  ;;  %3017 = vmatpush3.msra.mxu1 %v1422_v13 }
 0x2fd   :  { %3006 = vmatprep.subr.mxu0 %v1425_v12  ;;  %3018 = vmatprep.subr.mxu1 %v1421_v29 }
 0x2fe   :  { %3007 = vmatpush3.msra.mxu0 %v1425_v12  ;;  %3019 = vmatpush3.msra.mxu1 %v1421_v29 }
 0x2ff   :  { %3028 = vmatprep.subr.mxu0 %v3608_v27  ;;  %3020 = vmatprep.subr.mxu1 %v1420_v18 }
 0x300   :  { %3021 = vmatpush3.msra.mxu1 %v1420_v18 }
 0x3ae   :  { %v2968_v20 = vpop.f32.mrf.mxu1 }
 0x3b0   :  { %v1129_v22 = vpop.f32.mrf.mxu1 }
 0x3b2   :  { %v2971_v30 = vpop.f32.mrf.mxu1 }
 0x3b4   :  { %v1139_v33 = vpop.f32.mrf.mxu1 }
 0x3b5   :  { %v2982_v35 = vpop.f32.mrf.mxu0 }
 0x3b6   :  { %v1232_v34 = vadd.f32 %v2982_v35, %v2968_v20  ;;  %v2996_v37 = vpop.f32.mrf.mxu1 }
 0x3b7   :  { %v1226_v39 = vpop.f32.mrf.mxu0 }
 0x3b8   :  { %v1348_v40 = vadd.f32 %v2996_v37, %v1232_v34  ;;  %v1227_v41 = vadd.f32 %v1226_v39, %v1129_v22  ;;  %v1328_v42 = vpop.f32.mrf.mxu1 }
 0x3b9   :  { %v2985_v43 = vpop.f32.mrf.mxu0 }
 0x3ba   :  { %v1356_v44 = vadd.f32 %v1354_v38, %v1348_v40  ;;  %v1347_v45 = vadd.f32 %v1328_v42, %v1227_v41  ;;  %v1242_v47 = vadd.f32 %v2985_v43, %v2971_v30  ;;  %v2999_v49 = vpop.f32.mrf.mxu1  ;;  %v1626_v43 = vld [vmem:[#allocation2 + $0x170] sm:$0xff] }
 0x3bb   :  { %v1236_v50 = vpop.f32.mrf.mxu0 }
 0x3bc   :  { %v1360_v51 = vmul.f32 %v1356_v44, %v1356_v44  ;;  %v1355_v52 = vadd.f32 %v1354_v38, %v1347_v45  ;;  %v1350_v53 = vadd.f32 %v2999_v49, %v1242_v47  ;;  %v1237_v58 = vadd.f32 %v1236_v50, %v1139_v33  ;;  %v1338_v59 = vpop.f32.mrf.mxu1 }
 0x3be   :  { %v1364_v60 = vmul.f32 %v1360_v51, %v1356_v44  ;;  %v1359_v62 = vmul.f32 %v1355_v52, %v1355_v52  ;;  %v1358_v63 = vadd.f32 %v1354_v38, %v1350_v53  ;;  %v1349_v36 = vadd.f32 %v1338_v59, %v1237_v58 }
 0x3c0   :  { %v1368_v0 = vmul.f32 0.044715, %v1364_v60  ;;  %v1363_v6 = vmul.f32 %v1359_v62, %v1355_v52  ;;  %v1362_v7 = vmul.f32 %v1358_v63, %v1358_v63  ;;  %v1357_v8 = vadd.f32 %v1354_v38, %v1349_v36  ;;  %v1624_v36 = vld [vmem:[#allocation2 + $0x160] sm:$0xff] }
 0x3c2   :  { %v1372_v9 = vadd.f32 %v1368_v0, %v1356_v44  ;;  %v1367_v11 = vmul.f32 0.044715, %v1363_v6  ;;  %v1366_v14 = vmul.f32 %v1362_v7, %v1358_v63  ;;  %v1361_v23 = vmul.f32 %v1357_v8, %v1357_v8 }
 0x3c4   :  { %v1376_v16 = vmul.f32 0.7978846, %v1372_v9  ;;  %v1371_v17 = vadd.f32 %v1367_v11, %v1355_v52  ;;  %v1370_v28 = vmul.f32 0.044715, %v1366_v14  ;;  %v1365_v21 = vmul.f32 %v1361_v23, %v1357_v8  ;;  %v1753_v14 = vld [vmem:[%s3794_s5 + $0x10] sm:$0xff]  ;;  %v1921_v23 = vld [vmem:[#allocation2 + $0x1b8] sm:$0xff] }
 0x3c6   :  { %3178 = vtanh.f32 %v1376_v16  ;;  %v1375_v24 = vmul.f32 0.7978846, %v1371_v17  ;;  %v1374_v3 = vadd.f32 %v1370_v28, %v1358_v63  ;;  %v1369_v25 = vmul.f32 0.044715, %v1365_v21  ;;  %v1920_v16 = vld [vmem:[#allocation2 + $0x1b0] sm:$0xff]  ;;  %v1919_v17 = vld [vmem:[#allocation2 + $0x1a8] sm:$0xff] }
 0x3c7   :  { %v1916_v28 = vld [vmem:[#allocation2 + $0x198] sm:$0xff]  ;;  %v1918_v21 = vld [vmem:[#allocation2 + $0x1a0] sm:$0xff] }
 0x3c8   :  { %3180 = vtanh.f32 %v1375_v24  ;;  %v1378_v32 = vmul.f32 0.7978846, %v1374_v3  ;;  %v1373_v26 = vadd.f32 %v1369_v25, %v1357_v8  ;;  %v3662_v24 = vld [vmem:[#allocation2 + $0x1d8] sm:$0xff] }
 0x3ca   :  { %3182 = vtanh.f32 %v1378_v32  ;;  %v1377_v12 = vmul.f32 0.7978846, %v1373_v26  ;;  %v1731_v26 = vsub.s32 3, %v3408_v54 }
 0x3cc   :  { %3184 = vtanh.f32 %v1377_v12 }
 0x3d3   :  { %v3179_v13 = vpop.eup %3178 }
 0x3d4   :  { %v1384_v29 = vadd.f32 1.0, %v3179_v13 }
 0x3d5   :  { %v3181_v18 = vpop.eup %3180 }
 0x3d6   :  { %v1388_v20 = vmul.f32 0.5, %v1384_v29  ;;  %v1383_v22 = vadd.f32 1.0, %v3181_v18 }
 0x3d7   :  { %v3183_v30 = vpop.eup %3182 }
 0x3d8   :  { %v1392_v31 = vmul.f32 %v1388_v20, %v1356_v44  ;;  %v1387_v33 = vmul.f32 0.5, %v1383_v22  ;;  %v1386_v35 = vadd.f32 1.0, %v3183_v30  ;;  %v1732_v20 = vrot.slane %v3476_v55, %v1731_v26 }
 0x3d9   :  { %v3185_v34 = vpop.eup %3184 }
 0x3da   :  { %v1391_v37 = vmul.f32 %v1387_v33, %v1355_v52  ;;  %v1385_v38 = vadd.f32 1.0, %v3185_v34  ;;  %v1390_v39 = vmul.f32 0.5, %v1386_v35  ;;  %v1396_v40 = vrot.slane %v1392_v31, 6  ;;  %v1625_v52 = vld [vmem:[#allocation2 + $0x168] sm:$0xff] }
 0x3db   :  { %v1408_v49 = vrot.slane %v1392_v31, 2 }
 0x3dc   :  { %v1395_v41 = vrot.slane %v1391_v37, 6  ;;  %v1407_v42 = vrot.slane %v1391_v37, 2  ;;  %3008 = vmatprep.mubr.msk.f32.mxu0 %vm278_vm6, %v1391_v37  ;;  %v1389_v45 = vmul.f32 0.5, %v1385_v38  ;;  %v1394_v47 = vmul.f32 %v1390_v39, %v1358_v63 }
 0x3dd   :  { %3009 = vmatmul.mubr.msk.f32.vlgmr.msra.gmra.mxu0 %vm278_vm6, %v1392_v31 }
 0x3de   :  { %v1401_v44 = vsel %vm1019_vm9, %v1395_v41, %v1396_v40  ;;  %3029 = vmatpush3.msra.mxu0 %v3608_v27  ;;  %v1393_v50 = vmul.f32 %v1389_v45, %v1357_v8  ;;  %v1398_v51 = vrot.slane %v1394_v47, 6  ;;  %v1410_v53 = vrot.slane %v1394_v47, 2 }
 0x3df   :  { %3030 = vmatprep.subr.mxu0 %v1626_v43  ;;  %v1413_v58 = vsel %vm1032_vm10, %v1407_v42, %v1408_v49  ;;  %v1404_v0 = vmul.f32 %v1401_v44, %v3564_v57 }
 0x3e0   :  { %v1397_v59 = vrot.slane %v1393_v50, 6  ;;  %v1409_v60 = vrot.slane %v1393_v50, 2  ;;  %3011 = vmatprep.mubr.msk.f32.mxu0 %vm278_vm6, %v1393_v50  ;;  %3031 = vmatpush3.msra.mxu0 %v1626_v43  ;;  %v1415_v62 = vmul.f32 %v1413_v58, %v3556_v48  ;;  %v1402_v63 = vsel %vm1019_vm9, %v1398_v51, %v1395_v41 }
 0x3e1   :  { %3012 = vmatmul.mubr.msk.f32.gmra.mxu0 %vm278_vm6, %v1394_v47  ;;  %3032 = vmatprep.subr.mxu0 %v1625_v52  ;;  %v1403_v27 = vmul.f32 %v1402_v63, %v3562_v56  ;;  %v1414_v11 = vsel %vm1032_vm10, %v1410_v53, %v1407_v42 }
 0x3e2   :  { %3033 = vmatpush3.msra.mxu0 %v1625_v52  ;;  %v1412_v6 = vsel %vm1032_vm10, %v1408_v49, %v1409_v60  ;;  %3036 = vmatprep.mubr.msk.f32.mxu0 %vm278_vm6, %v1415_v62  ;;  %v1400_v48 = vsel %vm1019_vm9, %v1396_v40, %v1397_v59  ;;  %v1411_v7 = vsel %vm1032_vm10, %v1409_v60, %v1410_v53 }
 0x3e3   :  { %3022 = vmatprep.mubr.msk.f32.mxu1 %vm278_vm6, %v1403_v27  ;;  %3034 = vmatprep.subr.mxu0 %v1624_v36  ;;  %v1405_v8 = vmul.f32 %v1400_v48, %v3572_v1  ;;  %v1416_v56 = vmul.f32 %v1412_v6, %v3574_v4  ;;  %v1417_v57 = vmul.f32 %v1411_v7, %v3576_v2  ;;  %v1754_v2 = vld [vmem:[%s3794_s5 + $0x18] sm:$0xff]  ;;  %v1913_v6 = vld [vmem:[#allocation2 + $0x180] sm:$0xff] }
 0x3e4   :  { %3023 = vmatmul.mubr.msk.f32.vlgmr.msra.gmra.mxu1 %vm278_vm6, %v1404_v0  ;;  %3035 = vmatpush3.msra.mxu0 %v1624_v36  ;;  %v1399_v9 = vsel %vm1019_vm9, %v1397_v59, %v1398_v51  ;;  %v1418_v4 = vmul.f32 %v1414_v11, %v3597_v46  ;;  %v1751_v46 = vld [vmem:[%s3794_s5] sm:$0xff]  ;;  %v1915_v59 = vld [vmem:[#allocation2 + $0x190] sm:$0xff]  ;;  %v1914_v36 = vld [vmem:[#allocation2 + $0x188] sm:$0xff] }
 0x3e5   :  { %3025 = vmatprep.mubr.msk.f32.mxu1 %vm278_vm6, %v1405_v8  ;;  %3037 = vmatmul.mubr.msk.f32.vlgmr.msra.gmra.mxu0 %vm278_vm6, %v1416_v56  ;;  %v1406_v1 = vmul.f32 %v1399_v9, %v3592_v10  ;;  %v1752_v10 = vld [vmem:[%s3794_s5 + $0x8] sm:$0xff] }
 0x3e6   :  { %3039 = vmatprep.mubr.msk.f32.mxu0 %vm278_vm6, %v1417_v57  ;;  %3042 = vmatprep.subr.mxu1 %v1754_v2 }
 0x3e7   :  { %3043 = vmatpush3.msra.mxu1 %v1754_v2  ;;  %3056 = vmatprep.subr.mxu0 %v1921_v23 }
 0x3e8   :  { %3026 = vmatmul.mubr.msk.f32.gmra.mxu1 %vm278_vm6, %v1406_v1  ;;  %3044 = vmatprep.subr.mxu1 %v1753_v14 }
 0x3e9   :  { %3040 = vmatmul.mubr.msk.f32.gmra.mxu0 %vm278_vm6, %v1418_v4  ;;  %3045 = vmatpush3.msra.mxu1 %v1753_v14 }
 0x3ea   :  { %3046 = vmatprep.subr.mxu1 %v1752_v10  ;;  %3057 = vmatpush3.msra.mxu0 %v1921_v23 }
 0x3eb   :  { %3047 = vmatpush3.msra.mxu1 %v1752_v10  ;;  %3058 = vmatprep.subr.mxu0 %v1920_v16 }
 0x3ec   :  { %3048 = vmatprep.subr.mxu1 %v1751_v46  ;;  %3059 = vmatpush3.msra.mxu0 %v1920_v16 }
 0x3ed   :  { %3049 = vmatpush3.msra.mxu1 %v1751_v46  ;;  %3060 = vmatprep.subr.mxu0 %v1919_v17 }
 0x3ee   :  { %3070 = vmatprep.subr.mxu1 %v1916_v28  ;;  %3061 = vmatpush3.msra.mxu0 %v1919_v17 }
 0x3ef   :  { %3062 = vmatprep.subr.mxu0 %v1918_v21 }
 0x3f0   :  { %3063 = vmatpush3.msra.mxu0 %v1918_v21 }
 0x3f1   :  { %3084 = vmatprep.subr.mxu0 %v3662_v24 }
 0x49d   :  { %v3010_v3 = vpop.f32.mrf.mxu0 }
 0x49f   :  { %v1507_v25 = vpop.f32.mrf.mxu0 }
 0x4a1   :  { %v3013_v32 = vpop.f32.mrf.mxu0 }
 0x4a3   :  { %v1517_v12 = vpop.f32.mrf.mxu0 }
 0x4a4   :  { %v3024_v13 = vpop.f32.mrf.mxu1 }
 0x4a5   :  { %v1610_v29 = vadd.f32 %v3024_v13, %v3010_v3  ;;  %v3038_v18 = vpop.f32.mrf.mxu0  ;;  %v2119_v13 = vld [vmem:[#allocation2 + $0x1d0] sm:$0xff] }
 0x4a6   :  { %v1604_v22 = vpop.f32.mrf.mxu1 }
 0x4a7   :  { %v1726_v30 = vadd.f32 %v3038_v18, %v1610_v29  ;;  %v1605_v31 = vadd.f32 %v1604_v22, %v1507_v25  ;;  %v1706_v33 = vpop.f32.mrf.mxu0 }
 0x4a8   :  { %v3027_v35 = vpop.f32.mrf.mxu1 }
 0x4a9   :  { %v1734_v34 = vadd.f32 %v1732_v20, %v1726_v30  ;;  %v1725_v37 = vadd.f32 %v1706_v33, %v1605_v31  ;;  %v1620_v38 = vadd.f32 %v3027_v35, %v3013_v32  ;;  %v3041_v39 = vpop.f32.mrf.mxu0  ;;  %v2118_v33 = vld [vmem:[#allocation2 + $0x1c8] sm:$0xff] }
 0x4aa   :  { %v1614_v40 = vpop.f32.mrf.mxu1 }
 0x4ab   :  { %v1738_v41 = vadd.f32 %v1734_v34, %v3522_v61  ;;  %v1733_v42 = vadd.f32 %v1732_v20, %v1725_v37  ;;  %v1728_v43 = vadd.f32 %v3041_v39, %v1620_v38  ;;  %v1615_v45 = vadd.f32 %v1614_v40, %v1517_v12  ;;  %v1716_v47 = vpop.f32.mrf.mxu0  ;;  %v3683_v34 = vld [vmem:[#allocation5 + $0x40] sm:$0xff]  ;;  %v3685_v37 = vld [vmem:[#allocation5 + $0x48] sm:$0xff] }
 0x4ac   :  { %v2117_v39 = vld [vmem:[#allocation2 + $0x1c0] sm:$0xff] }
 0x4ad   :  { %v1860_v49 = vmul.f32 %v1738_v41, %v1738_v41  ;;  %v1737_v44 = vadd.f32 %v1733_v42, %v3527_v5  ;;  %v1736_v55 = vadd.f32 %v1732_v20, %v1728_v43  ;;  %v1727_v50 = vadd.f32 %v1716_v47, %v1615_v45  ;;  %v3693_v42 = vld [vmem:[#allocation7 + $0x48] sm:$0xff]  ;;  %v3695_v43 = vld [vmem:[#allocation7 + $0x50] sm:$0xff] }
 0x4af   :  { %v1864_v51 = vmul.f32 %v1860_v49, %v1738_v41  ;;  %v1859_v52 = vmul.f32 %v1737_v44, %v1737_v44  ;;  %v1740_v53 = vadd.f32 %v1736_v55, %v3533_v19  ;;  %v1735_v58 = vadd.f32 %v1732_v20, %v1727_v50  ;;  %3050 = vmatprep.mubr.msk.f32.mxu1 %vm278_vm6, %v1737_v44  ;;  %v3677_v20 = vld [vmem:[#allocation7 + $0x40] sm:$0xff] }
 0x4b0   :  { %3051 = vmatmul.mubr.msk.f32.vlgmr.msra.gmra.mxu1 %vm278_vm6, %v1738_v41 }
 0x4b1   :  { %v1868_v61 = vmul.f32 0.044715, %v1864_v51  ;;  %v1862_v60 = vmul.f32 %v1740_v53, %v1740_v53  ;;  %v1739_v62 = vadd.f32 %v1735_v58, %v3538_v15  ;;  %v1863_v63 = vmul.f32 %v1859_v52, %v1737_v44  ;;  %3071 = vmatpush3.msra.mxu1 %v1916_v28  ;;  %v3709_v52 = vld [vmem:[#allocation5 + $0x58] sm:$0xff] }
 0x4b2   :  { %3072 = vmatprep.subr.mxu1 %v1915_v59 }
 0x4b3   :  { %v1872_v5 = vadd.f32 %v1868_v61, %v1738_v41  ;;  %v1861_v27 = vmul.f32 %v1739_v62, %v1739_v62  ;;  %3053 = vmatprep.mubr.msk.f32.mxu1 %vm278_vm6, %v1739_v62  ;;  %v1867_v0 = vmul.f32 0.044715, %v1863_v63  ;;  %3073 = vmatpush3.msra.mxu1 %v1915_v59  ;;  %v1866_v19 = vmul.f32 %v1862_v60, %v1740_v53  ;;  %v2291_v61 = vld [vmem:[#allocation2 + $0x218] sm:$0xff]  ;;  %v2290_v60 = vld [vmem:[#allocation2 + $0x210] sm:$0xff] }
 0x4b4   :  { %3054 = vmatmul.mubr.msk.f32.gmra.mxu1 %vm278_vm6, %v1740_v53  ;;  %3074 = vmatprep.subr.mxu1 %v1914_v36  ;;  %v2286_v63 = vld [vmem:[#allocation2 + $0x1f8] sm:$0xff] }
 0x4b5   :  { %v1876_v48 = vmul.f32 0.7978846, %v1872_v5  ;;  %v1871_v7 = vadd.f32 %v1867_v0, %v1737_v44  ;;  %v1865_v8 = vmul.f32 %v1861_v27, %v1739_v62  ;;  %3075 = vmatpush3.msra.mxu1 %v1914_v36  ;;  %v1870_v15 = vmul.f32 0.044715, %v1866_v19  ;;  %v2288_v36 = vld [vmem:[#allocation2 + $0x200] sm:$0xff]  ;;  %v2285_v5 = vld [vmem:[#allocation2 + $0x1f0] sm:$0xff] }
 0x4b6   :  { %3076 = vmatprep.subr.mxu1 %v1913_v6  ;;  %v3721_v27 = vld [vmem:[#allocation2 + $0x238] sm:$0xff]  ;;  %v2284_v0 = vld [vmem:[#allocation2 + $0x1e8] sm:$0xff]  ;;  %v2283_v19 = vld [vmem:[#allocation2 + $0x1e0] sm:$0xff] }
 0x4b7   :  { %3186 = vtanh.f32 %v1876_v48  ;;  %v1875_v56 = vmul.f32 0.7978846, %v1871_v7  ;;  %v1869_v57 = vmul.f32 0.044715, %v1865_v8  ;;  %v1874_v9 = vadd.f32 %v1870_v15, %v1740_v53  ;;  %3077 = vmatpush3.msra.mxu1 %v1913_v6 }
 0x4b8   :  { %3098 = vmatprep.subr.mxu1 %v2291_v61 }
 0x4b9   :  { %3188 = vtanh.f32 %v1875_v56  ;;  %v1873_v11 = vadd.f32 %v1869_v57, %v1739_v62  ;;  %v1878_v1 = vmul.f32 0.7978846, %v1874_v9  ;;  %v2224_v57 = vsub.s32 4, %v3408_v54 }
 0x4bb   :  { %v1877_v4 = vmul.f32 0.7978846, %v1873_v11  ;;  %3190 = vtanh.f32 %v1878_v1 }
 0x4bd   :  { %3192 = vtanh.f32 %v1877_v4 }
 0x4c4   :  { %v3187_v2 = vpop.eup %3186 }
 0x4c5   :  { %v1884_v14 = vadd.f32 1.0, %v3187_v2 }
 0x4c6   :  { %v3189_v10 = vpop.eup %3188 }
 0x4c7   :  { %v1888_v46 = vmul.f32 0.5, %v1884_v14  ;;  %v1883_v23 = vadd.f32 1.0, %v3189_v10  ;;  %v3737_v14 = vld [vmem:[%s3793_s4] sm:$0x3f] }
 0x4c8   :  { %v3191_v16 = vpop.eup %3190  ;;  %v2225_v10 = vrot.slane %v3737_v14, %v2224_v57 }
 0x4c9   :  { %v1892_v17 = vmul.f32 %v1888_v46, %v1738_v41  ;;  %v1887_v28 = vmul.f32 0.5, %v1883_v23  ;;  %v1886_v21 = vadd.f32 1.0, %v3191_v16  ;;  %v3691_v41 = vld [vmem:[#allocation5 + $0x50] sm:$0xff] }
 0x4ca   :  { %v3193_v3 = vpop.eup %3192 }
 0x4cb   :  { %v1891_v25 = vmul.f32 %v1887_v28, %v1737_v44  ;;  %v1885_v32 = vadd.f32 1.0, %v3193_v3  ;;  %v1890_v26 = vmul.f32 0.5, %v1886_v21  ;;  %v1896_v22 = vrot.slane %v1892_v17, 4 }
 0x4cd   :  { %v1895_v12 = vrot.slane %v1891_v25, 4  ;;  %3064 = vmatprep.mubr.msk.f32.mxu0 %vm278_vm6, %v1891_v25  ;;  %v1889_v29 = vmul.f32 0.5, %v1885_v32  ;;  %v1894_v18 = vmul.f32 %v1890_v26, %v1740_v53  ;;  %v3712_v53 = vld [vmem:[#allocation7 + $0x58] sm:$0xff] }
 0x4ce   :  { %3065 = vmatmul.mubr.msk.f32.vlgmr.msra.gmra.mxu0 %vm278_vm6, %v1892_v17 }
 0x4cf   :  { %3085 = vmatpush3.msra.mxu0 %v3662_v24  ;;  %v1893_v30 = vmul.f32 %v1889_v29, %v1739_v62  ;;  %v1898_v31 = vrot.slane %v1894_v18, 4  ;;  %v1902_v35 = vsel %vm1899_vm11, %v1895_v12, %v1896_v22  ;;  %v2289_v62 = vld [vmem:[#allocation2 + $0x208] sm:$0xff] }
 0x4d0   :  { %3086 = vmatprep.subr.mxu0 %v2119_v13  ;;  %v1908_v38 = vmul.f32 %v1902_v35, %v3677_v20  ;;  %v1905_v47 = vmul.f32 %v1902_v35, %v3685_v37 }
 0x4d1   :  { %v1897_v40 = vrot.slane %v1893_v30, 4  ;;  %3067 = vmatprep.mubr.msk.f32.mxu0 %vm278_vm6, %v1893_v30  ;;  %3087 = vmatpush3.msra.mxu0 %v2119_v13  ;;  %v1903_v24 = vsel %vm1899_vm11, %v1898_v31, %v1895_v12 }
 0x4d2   :  { %3068 = vmatmul.mubr.msk.f32.gmra.mxu0 %vm278_vm6, %v1894_v18  ;;  %3088 = vmatprep.subr.mxu0 %v2118_v33  ;;  %v1904_v45 = vmul.f32 %v1903_v24, %v3683_v34  ;;  %v1911_v59 = vmul.f32 %v1903_v24, %v3712_v53 }
 0x4d3   :  { %3089 = vmatpush3.msra.mxu0 %v2118_v33  ;;  %3092 = vmatprep.mubr.msk.f32.mxu0 %vm278_vm6, %v1908_v38  ;;  %v1901_v49 = vsel %vm1899_vm11, %v1896_v22, %v1897_v40  ;;  %v1900_v44 = vsel %vm1899_vm11, %v1897_v40, %v1898_v31 }
 0x4d4   :  { %3078 = vmatprep.mubr.msk.f32.mxu1 %vm278_vm6, %v1904_v45  ;;  %3090 = vmatprep.subr.mxu0 %v2117_v39  ;;  %v1906_v55 = vmul.f32 %v1901_v49, %v3691_v41  ;;  %v1909_v50 = vmul.f32 %v1901_v49, %v3693_v42  ;;  %v1910_v51 = vmul.f32 %v1900_v44, %v3695_v43 }
 0x4d5   :  { %3079 = vmatmul.mubr.msk.f32.vlgmr.msra.gmra.mxu1 %vm278_vm6, %v1905_v47  ;;  %3091 = vmatpush3.msra.mxu0 %v2117_v39  ;;  %v1907_v58 = vmul.f32 %v1900_v44, %v3709_v52 }
 0x4d6   :  { %3081 = vmatprep.mubr.msk.f32.mxu1 %vm278_vm6, %v1906_v55  ;;  %3093 = vmatmul.mubr.msk.f32.vlgmr.msra.gmra.mxu0 %vm278_vm6, %v1909_v50 }
 0x4d7   :  { %3095 = vmatprep.mubr.msk.f32.mxu0 %vm278_vm6, %v1910_v51  ;;  %3099 = vmatpush3.msra.mxu1 %v2291_v61 }
 0x4d8   :  { %3100 = vmatprep.subr.mxu1 %v2290_v60  ;;  %3112 = vmatprep.subr.mxu0 %v2286_v63 }
 0x4d9   :  { %3082 = vmatmul.mubr.msk.f32.gmra.mxu1 %vm278_vm6, %v1907_v58  ;;  %3113 = vmatpush3.msra.mxu0 %v2286_v63 }
 0x4da   :  { %3096 = vmatmul.mubr.msk.f32.gmra.mxu0 %vm278_vm6, %v1911_v59  ;;  %3101 = vmatpush3.msra.mxu1 %v2290_v60 }
 0x4db   :  { %3102 = vmatprep.subr.mxu1 %v2289_v62  ;;  %3114 = vmatprep.subr.mxu0 %v2285_v5 }
 0x4dc   :  { %3103 = vmatpush3.msra.mxu1 %v2289_v62  ;;  %3115 = vmatpush3.msra.mxu0 %v2285_v5 }
 0x4dd   :  { %3104 = vmatprep.subr.mxu1 %v2288_v36  ;;  %3116 = vmatprep.subr.mxu0 %v2284_v0 }
 0x4de   :  { %3105 = vmatpush3.msra.mxu1 %v2288_v36  ;;  %3117 = vmatpush3.msra.mxu0 %v2284_v0 }
 0x4df   :  { %3140 = vmatprep.subr.mxu1 %v3721_v27  ;;  %3118 = vmatprep.subr.mxu0 %v2283_v19 }
 0x4e0   :  { %3119 = vmatpush3.msra.mxu0 %v2283_v19 }
 0x4e1   :  { %3126 = vmatprep.subr.mxu0 %v3721_v27 }
 0x570   :  { %v3725_v6 = vpop.f32.mrf.mxu1 }
 0x572   :  { %v3727_v48 = vpop.f32.mrf.mxu1 }
 0x574   :  { %v3729_v8 = vpop.f32.mrf.mxu1 }
 0x576   :  { %v3732_v9 = vpop.f32.mrf.mxu1 }
 0x58e   :  { %v3066_v7 = vpop.f32.mrf.mxu0 }
 0x590   :  { %v2000_v15 = vpop.f32.mrf.mxu0 }
 0x592   :  { %v3069_v56 = vpop.f32.mrf.mxu0 }
 0x594   :  { %v2010_v11 = vpop.f32.mrf.mxu0 }
 0x595   :  { %v3080_v1 = vpop.f32.mrf.mxu1 }
 0x596   :  { %v2103_v4 = vadd.f32 %v3080_v1, %v3066_v7  ;;  %v3094_v2 = vpop.f32.mrf.mxu0 }
 0x597   :  { %v2097_v46 = vpop.f32.mrf.mxu1 }
 0x598   :  { %v2219_v23 = vadd.f32 %v3094_v2, %v2103_v4  ;;  %v2098_v16 = vadd.f32 %v2097_v46, %v2000_v15  ;;  %v2199_v17 = vpop.f32.mrf.mxu0 }
 0x599   :  { %v3083_v28 = vpop.f32.mrf.mxu1 }
 0x59a   :  { %v2227_v21 = vadd.f32 %v2225_v10, %v2219_v23  ;;  %v2218_v3 = vadd.f32 %v2199_v17, %v2098_v16  ;;  %v2113_v25 = vadd.f32 %v3083_v28, %v3069_v56  ;;  %v3097_v32 = vpop.f32.mrf.mxu0  ;;  %v2489_v17 = vld [vmem:[#allocation2 + $0x230] sm:$0xff] }
 0x59b   :  { %v2107_v26 = vpop.f32.mrf.mxu1 }
 0x59c   :  { %v2231_v12 = vmul.f32 %v2227_v21, %v2227_v21  ;;  %v2226_v13 = vadd.f32 %v2225_v10, %v2218_v3  ;;  %v2221_v29 = vadd.f32 %v3097_v32, %v2113_v25  ;;  %v2108_v18 = vadd.f32 %v2107_v26, %v2010_v11  ;;  %v2209_v22 = vpop.f32.mrf.mxu0  ;;  %v2488_v26 = vld [vmem:[#allocation2 + $0x228] sm:$0xff] }
 0x59e   :  { %v2235_v30 = vmul.f32 %v2231_v12, %v2227_v21  ;;  %v2230_v31 = vmul.f32 %v2226_v13, %v2226_v13  ;;  %v2229_v33 = vadd.f32 %v2225_v10, %v2221_v29  ;;  %v2220_v35 = vadd.f32 %v2209_v22, %v2108_v18  ;;  %v2487_v29 = vld [vmem:[#allocation2 + $0x220] sm:$0xff] }
 0x5a0   :  { %v2239_v38 = vmul.f32 0.044715, %v2235_v30  ;;  %v2234_v39 = vmul.f32 %v2230_v31, %v2226_v13  ;;  %v2233_v40 = vmul.f32 %v2229_v33, %v2229_v33  ;;  %v2228_v24 = vadd.f32 %v2225_v10, %v2220_v35 }
 0x5a2   :  { %v2243_v45 = vadd.f32 %v2239_v38, %v2227_v21  ;;  %v2238_v47 = vmul.f32 0.044715, %v2234_v39  ;;  %v2237_v49 = vmul.f32 %v2233_v40, %v2229_v33  ;;  %v2232_v44 = vmul.f32 %v2228_v24, %v2228_v24 }
 0x5a3   :  { %v2594_v40 = vsub.s32 5, %v3408_v54 }
 0x5a4   :  { %v2247_v55 = vmul.f32 0.7978846, %v2243_v45  ;;  %v2242_v50 = vadd.f32 %v2238_v47, %v2226_v13  ;;  %v2241_v51 = vmul.f32 0.044715, %v2237_v49  ;;  %v2236_v58 = vmul.f32 %v2232_v44, %v2228_v24 }
 0x5a5   :  { %v2595_v49 = vrot.slane %v3737_v14, %v2594_v40 }
 0x5a6   :  { %3194 = vtanh.f32 %v2247_v55  ;;  %v2246_v59 = vmul.f32 0.7978846, %v2242_v50  ;;  %v2245_v61 = vadd.f32 %v2241_v51, %v2229_v33  ;;  %v2240_v60 = vmul.f32 0.044715, %v2236_v58 }
 0x5a8   :  { %3196 = vtanh.f32 %v2246_v59  ;;  %v2249_v62 = vmul.f32 0.7978846, %v2245_v61  ;;  %v2244_v63 = vadd.f32 %v2240_v60, %v2228_v24 }
 0x5aa   :  { %3198 = vtanh.f32 %v2249_v62  ;;  %v2248_v36 = vmul.f32 0.7978846, %v2244_v63 }
 0x5ac   :  { %3200 = vtanh.f32 %v2248_v36 }
 0x5b3   :  { %v3195_v5 = vpop.eup %3194 }
 0x5b4   :  { %v2255_v0 = vadd.f32 1.0, %v3195_v5 }
 0x5b5   :  { %v3197_v19 = vpop.eup %3196 }
 0x5b6   :  { %v2259_v7 = vmul.f32 0.5, %v2255_v0  ;;  %v2254_v15 = vadd.f32 1.0, %v3197_v19 }
 0x5b7   :  { %v3199_v56 = vpop.eup %3198 }
 0x5b8   :  { %v2258_v57 = vmul.f32 0.5, %v2254_v15  ;;  %v2257_v11 = vadd.f32 1.0, %v3199_v56  ;;  %v2263_v4 = vmul.f32 %v2259_v7, %v2227_v21 }
 0x5b9   :  { %v3201_v1 = vpop.eup %3200 }
 0x5ba   :  { %v2262_v2 = vmul.f32 %v2258_v57, %v2226_v13  ;;  %v2256_v10 = vadd.f32 1.0, %v3201_v1  ;;  %v2261_v46 = vmul.f32 0.5, %v2257_v11  ;;  %v2267_v3 = vrot.slane %v2263_v4, 4 }
 0x5bc   :  { %v2266_v23 = vrot.slane %v2262_v2, 4  ;;  %3106 = vmatprep.mubr.msk.f32.mxu1 %vm278_vm6, %v2262_v2  ;;  %v2260_v16 = vmul.f32 0.5, %v2256_v10  ;;  %v2265_v28 = vmul.f32 %v2261_v46, %v2229_v33 }
 0x5bd   :  { %3107 = vmatmul.mubr.msk.f32.vlgmr.msra.gmra.mxu1 %vm278_vm6, %v2263_v4 }
 0x5be   :  { %3144 = vmatpush3.msra.mxu1 %v3721_v27  ;;  %v2264_v25 = vmul.f32 %v2260_v16, %v2228_v24  ;;  %v2269_v32 = vrot.slane %v2265_v28, 4  ;;  %v2272_v21 = vsel %vm1899_vm11, %v2266_v23, %v2267_v3 }
 0x5bf   :  { %3141 = vmatprep.subr.mxu1 %v2489_v17  ;;  %v2275_v22 = vmul.f32 %v2272_v21, %v3685_v37 }
 0x5c0   :  { %v2268_v12 = vrot.slane %v2264_v25, 4  ;;  %3109 = vmatprep.mubr.msk.f32.mxu1 %vm278_vm6, %v2264_v25  ;;  %3145 = vmatpush3.msra.mxu1 %v2489_v17  ;;  %v2273_v13 = vsel %vm1899_vm11, %v2269_v32, %v2266_v23 }
 0x5c1   :  { %3110 = vmatmul.mubr.msk.f32.gmra.mxu1 %vm278_vm6, %v2265_v28  ;;  %3142 = vmatprep.subr.mxu1 %v2488_v26  ;;  %v2274_v18 = vmul.f32 %v2273_v13, %v3683_v34  ;;  %v2281_v34 = vmul.f32 %v2273_v13, %v3712_v53 }
 0x5c2   :  { %3146 = vmatpush3.msra.mxu1 %v2488_v26  ;;  %v2271_v30 = vsel %vm1899_vm11, %v2267_v3, %v2268_v12  ;;  %v2270_v31 = vsel %vm1899_vm11, %v2268_v12, %v2269_v32 }
 0x5c3   :  { %3120 = vmatprep.mubr.msk.f32.mxu0 %vm278_vm6, %v2274_v18  ;;  %3143 = vmatprep.subr.mxu1 %v2487_v29  ;;  %v2276_v33 = vmul.f32 %v2271_v30, %v3691_v41  ;;  %v2280_v35 = vmul.f32 %v2270_v31, %v3695_v43  ;;  %v2277_v37 = vmul.f32 %v2270_v31, %v3709_v52 }
 0x5c4   :  { %3121 = vmatmul.mubr.msk.f32.vlgmr.msra.gmra.mxu0 %vm278_vm6, %v2275_v22  ;;  %3147 = vmatpush3.msra.mxu1 %v2487_v29  ;;  %v2278_v41 = vmul.f32 %v2272_v21, %v3677_v20  ;;  %v2279_v43 = vmul.f32 %v2271_v30, %v3693_v42  ;;  %v2680_v42 = vld [vmem:[%s3795_s6] ss:$0 sm:$0xff]  ;;  %s3294_s6 = smov [#allocation8]  }
 0x5c5   :  { %3127 = vmatpush3.msra.mxu0 %v3721_v27  ;;  %3123 = vmatprep.mubr.msk.f32.mxu0 %vm278_vm6, %v2276_v33  ;;  %v1856_v58 = vadd.f32 %v3729_v8, %v2680_v42  ;;  %v1846_v36 = vadd.f32 %v3725_v6, %v2680_v42  ;;  %v1851_v14 = vadd.f32 %v2680_v42, %v3732_v9  ;;  %s2613_s24 = sshll.u32 %s3294_s6, 4  ;;  %s2614_s24 = int_to_ptr.vmem [resolvable:$true] %s2613_s24 }
 0x5c6   :  { %3128 = vmatprep.subr.mxu0 %v2489_v17  ;;  %3137 = vmatprep.mubr.msk.f32.mxu1 %vm278_vm6, %v2280_v35  ;;  %v1841_v56 = vadd.f32 %v2680_v42, %v3727_v48  ;;  %s3263_s3 = scalar_lea.vmem %s2614_s24, 512  ;;  %p3268_p2 = scmp.lt.s32.totalorder %s2614_s24, %s2614_s24 }
 0x5c7   :  { %3129 = vmatpush3.msra.mxu0 %v2489_v17  ;;  %3138 = vmatmul.mubr.msk.f32.vlgmr.msra.gmra.mxu1 %vm278_vm6, %v2281_v34  ;;  %p3264_p1 = scmp.ne.s32.totalorder %s2614_s24, %s3263_s3  ;;  %p3269_p3 = scmp.lt.s32.totalorder %s3263_s3, %s3263_s3 }
 0x5c8   :  { %3130 = vmatprep.subr.mxu0 %v2488_v26  ;;  %3124 = vmatmul.mubr.msk.f32.gmra.mxu0 %vm278_vm6, %v2277_v37 }
 0x5c9   :  { %3131 = vmatpush3.msra.mxu0 %v2488_v26  ;;  %3134 = vmatprep.mubr.msk.f32.mxu0 %vm278_vm6, %v2278_v41  ;;  %p3270_p4 = por %p3269_p3, %p3268_p2 }
 0x5ca   :  { %3132 = vmatprep.subr.mxu0 %v2487_v29 }
 0x5cb   :  { %3133 = vmatpush3.msra.mxu0 %v2487_v29  ;;  %p3271_p5 = pnand %p3270_p4, %p3264_p1 }
 0x5cc   :  { %3135 = vmatmul.mubr.msk.f32.vlgmr.msra.gmra.mxu0 %vm278_vm6, %v2279_v43 }
 0x67d   :  { %v3108_v53 = vpop.f32.mrf.mxu1 }
 0x67f   :  { %v2370_v27 = vpop.f32.mrf.mxu1 }
 0x681   :  { %v3111_v52 = vpop.f32.mrf.mxu1 }
 0x683   :  { %v2380_v38 = vpop.f32.mrf.mxu1 }
 0x684   :  { %v3122_v39 = vpop.f32.mrf.mxu0 }
 0x685   :  { %v2473_v55 = vadd.f32 %v3122_v39, %v3108_v53 }
 0x686   :  { %v2467_v20 = vpop.f32.mrf.mxu0 }
 0x687   :  { %v3139_v24 = vpop.f32.mrf.mxu1  ;;  %v2468_v60 = vadd.f32 %v2467_v20, %v2370_v27 }
 0x688   :  { %v3125_v45 = vpop.f32.mrf.mxu0 }
 0x689   :  { %v2483_v47 = vadd.f32 %v3125_v45, %v3111_v52  ;;  %v2579_v59 = vpop.f32.mrf.mxu1 }
 0x68a   :  { %v2477_v44 = vpop.f32.mrf.mxu0 }
 0x68b   :  { %v2591_v50 = vadd.f32 %v3139_v24, %v2483_v47  ;;  %v2478_v51 = vadd.f32 %v2477_v44, %v2380_v38 }
 0x68c   :  { %v3136_v61 = vpop.f32.mrf.mxu0 }
 0x68d   :  { %v2599_v54 = vadd.f32 %v2595_v49, %v2591_v50  ;;  %v2590_v62 = vadd.f32 %v2579_v59, %v2478_v51  ;;  %v2589_v63 = vadd.f32 %v3136_v61, %v2473_v55 }
 0x68e   :  { %v2569_v5 = vpop.f32.mrf.mxu0 }
 0x68f   :  { %v2603_v0 = vadd.f32 %v2599_v54, %v1856_v58  ;;  %v2598_v19 = vadd.f32 %v2595_v49, %v2590_v62  ;;  %v2597_v7 = vadd.f32 %v2595_v49, %v2589_v63  ;;  %v2588_v15 = vadd.f32 %v2569_v5, %v2468_v60 }
 0x691   :  { %2607 = vst.msk [vmem:[#allocation8 + $0x18] sm:$0xff] %vm278_vm6, %v2603_v0  ;;  %v2602_v8 = vadd.f32 %v2598_v19, %v1851_v14  ;;  %v2601_v57 = vadd.f32 %v2597_v7, %v1846_v36  ;;  %v2596_v11 = vadd.f32 %v2595_v49, %v2588_v15 }
 0x693   :  { %2606 = vst.msk [vmem:[#allocation8 + $0x10] sm:$0xff] %vm278_vm6, %v2602_v8  ;;  %2605 = vst.msk [vmem:[#allocation8 + $0x8] sm:$0xff] %vm278_vm6, %v2601_v57  ;;  %v2600_v6 = vadd.f32 %v2596_v11, %v1841_v56 }
 0x695   :  { %2604 = vst.msk [vmem:[#allocation8] sm:$0xff] %vm278_vm6, %v2600_v6 }
 0x696   :  { %3274 = shalt.err (!%p3271_p5)
}
 0x697   :  { %2619 = dma.vmem_to_hbm [thread:$0]  %s2614_s24, 512, %s3798_s9, [#allocation4], %s3291_s14, %s3291_s14, %s3292_s15  }
 0x698   :  { %3287 = dma.done.wait [#allocation4], 512  }
 0x699   :  { %3288 = vsyncadd [#allocation4], 4294966784 }
 0x69a   :  { %2623 = vsyncpa [#allocation3], 1 }
 0x69b   :  { %2624 = vsyncpa [#allocation6], 1 }
 0x69c   :  { %2625 = vsyncpa [#allocation4], 1 }

</bundles_post_ra>
